<compile_context>
chip_gen: v6e
topology: v6e:2x2x1
jax: 0.10.0
libtpu: 0.0.40
codegen_flags: <defaults>
</compile_context>

<pallas_src>
import functools

import jax
import jax.numpy as jnp
from jax import lax
from jax.experimental import pallas as pl
from jax.experimental.pallas import tpu as pltpu

EPS = 1e-5           # nn.InstanceNorm3d default eps
NEG_SLOPE = 0.01     # nn.LeakyReLU(negative_slope=0.01)
PREC = lax.Precision.HIGHEST   # used only by the pure-JAX reference


# ---------------------------------------------------------------------------
# in-kernel helpers (operate on (C, S) float32 values)
# ---------------------------------------------------------------------------
def _instance_norm(h, gamma, beta, inv_s):
    # One-pass biased statistics (matches PyTorch InstanceNorm): var clamped
    # at 0 to guard against cancellation; everything stays f32.
    mean = jnp.sum(h, axis=1, keepdims=True) * inv_s
    ex2 = jnp.sum(h * h, axis=1, keepdims=True) * inv_s
    var = jnp.maximum(ex2 - mean * mean, 0.0)
    return (h - mean) * lax.rsqrt(var + EPS) * gamma + beta


def _leaky_relu(h):
    return jnp.where(h >= 0, h, NEG_SLOPE * h)


# ---------------------------------------------------------------------------
# fused Pallas kernel: conv1x1 + IN + LReLU, conv3x3x3 + IN + LReLU,
#                      conv1x1 + IN + residual + LReLU     (one batch sample)
# ---------------------------------------------------------------------------
def _bottleneck_kernel(x_ref, w1_ref, w2_ref, w3_ref, gb_ref, mask_ref,
                       o_ref, *, dims):
    D, H, W = dims
    S = x_ref.shape[2]
    WP = w1_ref.shape[0]        # padded width (multiple of 8)
    Cout = w3_ref.shape[0]
    inv_s = 1.0 / S             # static

    # packed per-channel affine params: cols [g1, b1, g2, b2, g3, b3]
    gb = gb_ref[...]
    g1, b1 = gb[:WP, 0:1], gb[:WP, 1:2]
    g2, b2 = gb[:WP, 2:3], gb[:WP, 3:4]
    g3, b3 = gb[:Cout, 4:5], gb[:Cout, 5:6]

    x = x_ref[0]                               # (Cin, S) bf16; reused for residual

    # ---- stage 1: 1x1x1 conv + IN + LeakyReLU ---------------------------
    h1 = jnp.dot(w1_ref[...], x, preferred_element_type=jnp.float32)   # (WP, S)
    h1 = _leaky_relu(_instance_norm(h1, g1, b1, inv_s))

    # ---- stage 2: 3x3x3 conv as a single K-stacked matmul ----------------
    # Build the (27*WP, S) im2col slab in VMEM: 26 lane rotations of h1, each
    # multiplied by a precomputed 0/1 boundary-mask row (no in-kernel index
    # math), f32 chunks of 8 rows so the sublane concat is tile-aligned.
    masks = mask_ref[...]                      # (32, S) f32; rows 0..26 valid
    hw = H * W
    taps = []
    k = 0
    for dd in (-1, 0, 1):
        for dh in (-1, 0, 1):
            for dw in (-1, 0, 1):
                off = dd * hw + dh * W + dw
                # src[:, s] = h1[:, s + off]  (circular; wrap is masked below)
                src = h1 if off == 0 else pltpu.roll(h1, shift=(-off) % S, axis=1)
                if k != 13:                    # center tap needs no mask
                    src = src * masks[k]
                taps.append(src)
                k += 1
    slab = jnp.concatenate(taps, axis=0)       # (27*WP, S) f32
    h2 = jnp.dot(w2_ref[...], slab, preferred_element_type=jnp.float32)  # (WP, S)
    h2 = _leaky_relu(_instance_norm(h2, g2, b2, inv_s))

    # ---- stage 3: 1x1x1 conv + IN + residual add + LeakyReLU ------------
    h3 = jnp.dot(w3_ref[...], h2, preferred_element_type=jnp.float32)   # (Cout, S)
    h3 = _instance_norm(h3, g3, b3, inv_s) + x.astype(jnp.float32)
    o_ref[0] = _leaky_relu(h3).astype(o_ref.dtype)


# ---------------------------------------------------------------------------
# wrapper
# ---------------------------------------------------------------------------
def _vmem_limit_bytes() -> int:
    # Generation-aware VMEM limit: ~3/4 of physical, capped; 48 MiB on v7x
    # (64 MiB physical), 96 MiB on v5e/v6e (128 MiB physical).
    try:
        cap = int(pltpu.get_tpu_info().vmem_capacity_bytes)
    except Exception:
        cap = 128 * 1024 * 1024
    return int(min((cap * 3) // 4, 112 * 1024 * 1024))


@jax.jit
def bottleneck_3d(x, params):
    """x: (N, Cin, D, H, W) f32; stride=1, downsample=None (Cin == 4*planes)."""
    N, Cin, D, H, W = x.shape
    S = D * H * W
    w1 = params["w1"]            # (width, Cin)
    w2 = params["w2"]            # (width, width, 3, 3, 3) -- PyTorch OIDHW
    w3 = params["w3"]            # (Cout, width)
    width = w1.shape[0]
    Cout = w3.shape[0]
    assert Cout == Cin, "downsample=None requires inplanes == planes*expansion"

    # pad width to a multiple of 8 (full f32 sublanes); padded channels are
    # exact zeros all the way through (zero weights, zero gamma/beta).
    WP = max(8, ((width + 7) // 8) * 8)

    # stage-1 weights: bf16 (input arrives bf16)
    w1b = jnp.zeros((WP, Cin), jnp.bfloat16).at[:width, :].set(
        w1.astype(jnp.bfloat16))
    # stage-2 weights: lane-dense (WP, 27*WP) f32; column k*WP+i multiplies
    # slab rows of tap k / channel i.
    w2k = jnp.transpose(w2, (2, 3, 4, 0, 1)).reshape(27, width, width)   # (k,o,i)
    w2p = jnp.zeros((27, WP, WP), jnp.float32).at[:, :width, :width].set(w2k)
    w2f = jnp.transpose(w2p, (1, 0, 2)).reshape(WP, 27 * WP)             # (o, k*i)
    # stage-3 weights: f32 (tiny)
    w3f = jnp.zeros((Cout, WP), jnp.float32).at[:, :width].set(w3)

    # pack all gamma/beta into one tiny f32 block: cols [g1,b1,g2,b2,g3,b3]
    R = max(WP, Cout)
    gb = jnp.zeros((R, 8), jnp.float32)
    gb = gb.at[:width, 0].set(params["g1"]).at[:width, 1].set(params["b1"])
    gb = gb.at[:width, 2].set(params["g2"]).at[:width, 3].set(params["b2"])
    gb = gb.at[:Cout, 4].set(params["g3"]).at[:Cout, 5].set(params["b3"])

    # hoisted boundary masks: row k (same (dd,dh,dw) loop order as the kernel)
    # is 1.0 where the tap's source voxel (d+dd, h+dh, w+dw) is in bounds.
    sidx = jnp.arange(S, dtype=jnp.int32)
    d_i = sidx // (H * W)
    h_i = (sidx // W) % H
    w_i = sidx % W
    rows = []
    for dd in (-1, 0, 1):
        for dh in (-1, 0, 1):
            for dw in (-1, 0, 1):
                ok = ((d_i + dd >= 0) & (d_i + dd < D) &
                      (h_i + dh >= 0) & (h_i + dh < H) &
                      (w_i + dw >= 0) & (w_i + dw < W))
                rows.append(ok.astype(jnp.float32))
    masks = jnp.zeros((32, S), jnp.float32).at[:27, :].set(jnp.stack(rows))

    # bf16 at the call boundary (HBM-bound block); output stays f32.
    x2d = x.reshape(N, Cin, S).astype(jnp.bfloat16)

    # TODO(synk): for large D*H*W, tile S on an "arbitrary" grid axis with the
    # sum/sumsq InstanceNorm accumulated across S-tiles (plus a halo'd conv2
    # pass) so full-S blocks never exceed v7x's 64 MiB VMEM; also add a second
    # parallel axis when N==1 so both v7x TensorCores are used.
    kernel = functools.partial(_bottleneck_kernel, dims=(D, H, W))

    out2d = pl.pallas_call(
        kernel,
        out_shape=jax.ShapeDtypeStruct((N, Cout, S), x.dtype),
        grid=(N,),
        in_specs=[
            pl.BlockSpec((1, Cin, S), lambda n: (n, 0, 0)),    # x (also residual), bf16
            pl.BlockSpec((WP, Cin), lambda n: (0, 0)),         # w1 (bf16)
            pl.BlockSpec((WP, 27 * WP), lambda n: (0, 0)),     # w2 flattened, lane-dense
            pl.BlockSpec((Cout, WP), lambda n: (0, 0)),        # w3 (f32)
            pl.BlockSpec((R, 8), lambda n: (0, 0)),            # packed gamma/beta
            pl.BlockSpec((32, S), lambda n: (0, 0)),           # boundary masks
        ],
        out_specs=pl.BlockSpec((1, Cout, S), lambda n: (n, 0, 0)),
        compiler_params=pltpu.CompilerParams(
            dimension_semantics=("parallel",),
            vmem_limit_bytes=_vmem_limit_bytes(),
        ),
    )(x2d, w1b, w2f, w3f, gb, masks)

    return out2d.reshape(N, Cout, D, H, W)


# ---------------------------------------------------------------------------
# pure-JAX reference (f32, HIGHEST precision) for correctness check
# ---------------------------------------------------------------------------
def bottleneck_3d_ref(x, params):
    def conv1(x, w):
        return jnp.einsum("ncdhw,oc->nodhw", x, w, precision=PREC)

    def inorm(x, g, b):
        mean = x.mean(axis=(2, 3, 4), keepdims=True)
        var = ((x - mean) ** 2).mean(axis=(2, 3, 4), keepdims=True)
        xn = (x - mean) / jnp.sqrt(var + EPS)
        return xn * g[None, :, None, None, None] + b[None, :, None, None, None]

    def lrelu(x):
        return jnp.where(x >= 0, x, NEG_SLOPE * x)

    h = lrelu(inorm(conv1(x, params["w1"]), params["g1"], params["b1"]))
    h = lax.conv_general_dilated(
        h, params["w2"], window_strides=(1, 1, 1), padding="SAME",
        dimension_numbers=("NCDHW", "OIDHW", "NCDHW"), precision=PREC)
    h = lrelu(inorm(h, params["g2"], params["b2"]))
    h = inorm(conv1(h, params["w3"]), params["g3"], params["b3"])
    return lrelu(h + x)


# ---------------------------------------------------------------------------
if __name__ == "__main__":
    # module config (stride=1, downsample=None => inplanes == planes * 4)
    inplanes, planes = 16, 4
    width = planes          # base_width=64, groups=1 -> width = planes
    cout = planes * 4
    N, D, H, W = 2, 8, 8, 8

    key = jax.random.PRNGKey(0)
    k = jax.random.split(key, 9)
    params = {
        "w1": 0.1 * jax.random.normal(k[0], (width, inplanes), jnp.float32),
        "g1": 1.0 + 0.1 * jax.random.normal(k[1], (width,), jnp.float32),
        "b1": 0.05 * jax.random.normal(k[2], (width,), jnp.float32),
        "w2": 0.1 * jax.random.normal(k[3], (width, width, 3, 3, 3), jnp.float32),
        "g2": 1.0 + 0.1 * jax.random.normal(k[4], (width,), jnp.float32),
        "b2": 0.05 * jax.random.normal(k[5], (width,), jnp.float32),
        "w3": 0.1 * jax.random.normal(k[6], (cout, width), jnp.float32),
        "g3": jnp.ones((cout,), jnp.float32),
        "b3": jnp.zeros((cout,), jnp.float32),
    }
    x = jax.random.normal(k[8], (N, inplanes, D, H, W), jnp.float32)

    out = jax.block_until_ready(bottleneck_3d(x, params))
    ref = jax.block_until_ready(bottleneck_3d_ref(x, params))

    assert out.shape == (N, cout, D, H, W), out.shape
    assert bool(jnp.all(jnp.isfinite(out)))
    # bf16 input / stage-1 operands, f32 accumulation & stages 2-3 => slightly
    # looser tolerance than a pure-f32 path; still catches any structural
    # (shift/mask/IN/K-stack) bug.
    err = float(jnp.max(jnp.abs(out - ref)))
    assert jnp.allclose(out, ref, atol=3e-2, rtol=3e-2), err

    print("KERNEL_OK")
</pallas_src>

<mosaic_0001>
module attributes {stable_mosaic.version = 11 : i64} {
  func.func @_bottleneck_kernel(%arg0: i32, %arg1: memref<1x16x512xbf16, #tpu.memory_space<vmem>>, %arg2: memref<8x16xbf16, #tpu.memory_space<vmem>>, %arg3: memref<8x216xf32, #tpu.memory_space<vmem>>, %arg4: memref<16x8xf32, #tpu.memory_space<vmem>>, %arg5: memref<16x8xf32, #tpu.memory_space<vmem>>, %arg6: memref<32x512xf32, #tpu.memory_space<vmem>>, %arg7: memref<1x16x512xf32, #tpu.memory_space<vmem>>) attributes {dimension_semantics = [#tpu.dimension_semantics<parallel>], iteration_bounds = array<i64: 2>, scalar_prefetch = 0 : i64, scratch_operands = 0 : i64, tpu.core_type = #tpu.core_type<tc>, window_params = [{transform_indices = @transform_0, window_bounds = array<i64: 1, 16, 512>}, {pipeline_mode = #tpu.pipeline_mode<synchronous>, transform_indices = @transform_1, window_bounds = array<i64: 8, 16>}, {pipeline_mode = #tpu.pipeline_mode<synchronous>, transform_indices = @transform_2, window_bounds = array<i64: 8, 216>}, {pipeline_mode = #tpu.pipeline_mode<synchronous>, transform_indices = @transform_3, window_bounds = array<i64: 16, 8>}, {pipeline_mode = #tpu.pipeline_mode<synchronous>, transform_indices = @transform_4, window_bounds = array<i64: 16, 8>}, {pipeline_mode = #tpu.pipeline_mode<synchronous>, transform_indices = @transform_5, window_bounds = array<i64: 32, 512>}, {transform_indices = @transform_6, window_bounds = array<i64: 1, 16, 512>}]} {
    %c0 = arith.constant 0 : index
    %c0_0 = arith.constant 0 : index
    %0 = vector.load %arg5[%c0, %c0_0] : memref<16x8xf32, #tpu.memory_space<vmem>>, vector<16x8xf32>
    %1 = vector.extract_strided_slice %0 {offsets = [0, 0], sizes = [8, 1], strides = [1, 1]} : vector<16x8xf32> to vector<8x1xf32>
    %2 = vector.extract_strided_slice %0 {offsets = [0, 1], sizes = [8, 1], strides = [1, 1]} : vector<16x8xf32> to vector<8x1xf32>
    %3 = vector.extract_strided_slice %0 {offsets = [0, 2], sizes = [8, 1], strides = [1, 1]} : vector<16x8xf32> to vector<8x1xf32>
    %4 = vector.extract_strided_slice %0 {offsets = [0, 3], sizes = [8, 1], strides = [1, 1]} : vector<16x8xf32> to vector<8x1xf32>
    %5 = vector.extract_strided_slice %0 {offsets = [0, 4], sizes = [16, 1], strides = [1, 1]} : vector<16x8xf32> to vector<16x1xf32>
    %6 = vector.extract_strided_slice %0 {offsets = [0, 5], sizes = [16, 1], strides = [1, 1]} : vector<16x8xf32> to vector<16x1xf32>
    %c0_1 = arith.constant 0 : index
    %c0_2 = arith.constant 0 : index
    %c0_3 = arith.constant 0 : index
    %7 = vector.load %arg1[%c0_1, %c0_2, %c0_3] : memref<1x16x512xbf16, #tpu.memory_space<vmem>>, vector<1x16x512xbf16>
    %8 = vector.shape_cast %7 : vector<1x16x512xbf16> to vector<16x512xbf16>
    %c0_4 = arith.constant 0 : index
    %c0_5 = arith.constant 0 : index
    %9 = vector.load %arg2[%c0_4, %c0_5] : memref<8x16xbf16, #tpu.memory_space<vmem>>, vector<8x16xbf16>
    %cst = arith.constant dense<0.000000e+00> : vector<8x512xf32>
    %10 = tpu.matmul %9, %8, %cst {dimension_numbers = #tpu.dot_dimension_numbers<[1], [0], [0], [1], [0, 0, 1, 1], [], []>} : vector<8x16xbf16>, vector<16x512xbf16>, vector<8x512xf32> -> vector<8x512xf32>
    %cst_6 = arith.constant dense<0.000000e+00> : vector<8xf32>
    %11 = vector.multi_reduction <add>, %10, %cst_6 [1] : vector<8x512xf32> to vector<8xf32>
    %12 = vector.shape_cast %11 : vector<8xf32> to vector<8x1xf32>
    %cst_7 = arith.constant 0.001953125 : f32
    %13 = vector.broadcast %cst_7 : f32 to vector<8x1xf32>
    %14 = arith.mulf %12, %13 : vector<8x1xf32>
    %15 = arith.mulf %10, %10 : vector<8x512xf32>
    %cst_8 = arith.constant dense<0.000000e+00> : vector<8xf32>
    %16 = vector.multi_reduction <add>, %15, %cst_8 [1] : vector<8x512xf32> to vector<8xf32>
    %17 = vector.shape_cast %16 : vector<8xf32> to vector<8x1xf32>
    %cst_9 = arith.constant 0.001953125 : f32
    %18 = vector.broadcast %cst_9 : f32 to vector<8x1xf32>
    %19 = arith.mulf %17, %18 : vector<8x1xf32>
    %20 = arith.mulf %14, %14 : vector<8x1xf32>
    %21 = arith.subf %19, %20 : vector<8x1xf32>
    %cst_10 = arith.constant 0.000000e+00 : f32
    %22 = vector.broadcast %cst_10 : f32 to vector<8x1xf32>
    %23 = arith.maximumf %21, %22 : vector<8x1xf32>
    %24 = vector.broadcast %14 : vector<8x1xf32> to vector<8x512xf32>
    %25 = arith.subf %10, %24 : vector<8x512xf32>
    %cst_11 = arith.constant 9.99999974E-6 : f32
    %26 = vector.broadcast %cst_11 : f32 to vector<8x1xf32>
    %27 = arith.addf %23, %26 : vector<8x1xf32>
    %28 = math.rsqrt %27 : vector<8x1xf32>
    %29 = vector.broadcast %28 : vector<8x1xf32> to vector<8x512xf32>
    %30 = arith.mulf %25, %29 : vector<8x512xf32>
    %31 = vector.broadcast %1 : vector<8x1xf32> to vector<8x512xf32>
    %32 = arith.mulf %30, %31 : vector<8x512xf32>
    %33 = vector.broadcast %2 : vector<8x1xf32> to vector<8x512xf32>
    %34 = arith.addf %32, %33 : vector<8x512xf32>
    %cst_12 = arith.constant 0.000000e+00 : f32
    %35 = vector.broadcast %cst_12 : f32 to vector<8x512xf32>
    %36 = arith.cmpf oge, %34, %35 : vector<8x512xf32>
    %cst_13 = arith.constant 0.00999999977 : f32
    %37 = vector.broadcast %cst_13 : f32 to vector<8x512xf32>
    %38 = arith.mulf %37, %34 : vector<8x512xf32>
    %39 = arith.select %36, %34, %38 : vector<8x512xi1>, vector<8x512xf32>
    %c0_14 = arith.constant 0 : index
    %c0_15 = arith.constant 0 : index
    %40 = vector.load %arg6[%c0_14, %c0_15] : memref<32x512xf32, #tpu.memory_space<vmem>>, vector<32x512xf32>
    %c73_i32 = arith.constant 73 : i32
    %41 = tpu.dynamic_rotate %39 by %c73_i32 dim 1 : vector<8x512xf32>, i32 -> vector<8x512xf32>
    %42 = vector.extract_strided_slice %40 {offsets = [0, 0], sizes = [1, 512], strides = [1, 1]} : vector<32x512xf32> to vector<1x512xf32>
    %43 = vector.shape_cast %42 : vector<1x512xf32> to vector<512xf32>
    %44 = vector.shape_cast %43 : vector<512xf32> to vector<1x512xf32>
    %45 = vector.broadcast %44 : vector<1x512xf32> to vector<8x512xf32>
    %46 = arith.mulf %41, %45 : vector<8x512xf32>
    %c72_i32 = arith.constant 72 : i32
    %47 = tpu.dynamic_rotate %39 by %c72_i32 dim 1 : vector<8x512xf32>, i32 -> vector<8x512xf32>
    %48 = vector.extract_strided_slice %40 {offsets = [1, 0], sizes = [1, 512], strides = [1, 1]} : vector<32x512xf32> to vector<1x512xf32>
    %49 = vector.shape_cast %48 : vector<1x512xf32> to vector<512xf32>
    %50 = vector.shape_cast %49 : vector<512xf32> to vector<1x512xf32>
    %51 = vector.broadcast %50 : vector<1x512xf32> to vector<8x512xf32>
    %52 = arith.mulf %47, %51 : vector<8x512xf32>
    %c71_i32 = arith.constant 71 : i32
    %53 = tpu.dynamic_rotate %39 by %c71_i32 dim 1 : vector<8x512xf32>, i32 -> vector<8x512xf32>
    %54 = vector.extract_strided_slice %40 {offsets = [2, 0], sizes = [1, 512], strides = [1, 1]} : vector<32x512xf32> to vector<1x512xf32>
    %55 = vector.shape_cast %54 : vector<1x512xf32> to vector<512xf32>
    %56 = vector.shape_cast %55 : vector<512xf32> to vector<1x512xf32>
    %57 = vector.broadcast %56 : vector<1x512xf32> to vector<8x512xf32>
    %58 = arith.mulf %53, %57 : vector<8x512xf32>
    %c65_i32 = arith.constant 65 : i32
    %59 = tpu.dynamic_rotate %39 by %c65_i32 dim 1 : vector<8x512xf32>, i32 -> vector<8x512xf32>
    %60 = vector.extract_strided_slice %40 {offsets = [3, 0], sizes = [1, 512], strides = [1, 1]} : vector<32x512xf32> to vector<1x512xf32>
    %61 = vector.shape_cast %60 : vector<1x512xf32> to vector<512xf32>
    %62 = vector.shape_cast %61 : vector<512xf32> to vector<1x512xf32>
    %63 = vector.broadcast %62 : vector<1x512xf32> to vector<8x512xf32>
    %64 = arith.mulf %59, %63 : vector<8x512xf32>
    %c64_i32 = arith.constant 64 : i32
    %65 = tpu.dynamic_rotate %39 by %c64_i32 dim 1 : vector<8x512xf32>, i32 -> vector<8x512xf32>
    %66 = vector.extract_strided_slice %40 {offsets = [4, 0], sizes = [1, 512], strides = [1, 1]} : vector<32x512xf32> to vector<1x512xf32>
    %67 = vector.shape_cast %66 : vector<1x512xf32> to vector<512xf32>
    %68 = vector.shape_cast %67 : vector<512xf32> to vector<1x512xf32>
    %69 = vector.broadcast %68 : vector<1x512xf32> to vector<8x512xf32>
    %70 = arith.mulf %65, %69 : vector<8x512xf32>
    %c63_i32 = arith.constant 63 : i32
    %71 = tpu.dynamic_rotate %39 by %c63_i32 dim 1 : vector<8x512xf32>, i32 -> vector<8x512xf32>
    %72 = vector.extract_strided_slice %40 {offsets = [5, 0], sizes = [1, 512], strides = [1, 1]} : vector<32x512xf32> to vector<1x512xf32>
    %73 = vector.shape_cast %72 : vector<1x512xf32> to vector<512xf32>
    %74 = vector.shape_cast %73 : vector<512xf32> to vector<1x512xf32>
    %75 = vector.broadcast %74 : vector<1x512xf32> to vector<8x512xf32>
    %76 = arith.mulf %71, %75 : vector<8x512xf32>
    %c57_i32 = arith.constant 57 : i32
    %77 = tpu.dynamic_rotate %39 by %c57_i32 dim 1 : vector<8x512xf32>, i32 -> vector<8x512xf32>
    %78 = vector.extract_strided_slice %40 {offsets = [6, 0], sizes = [1, 512], strides = [1, 1]} : vector<32x512xf32> to vector<1x512xf32>
    %79 = vector.shape_cast %78 : vector<1x512xf32> to vector<512xf32>
    %80 = vector.shape_cast %79 : vector<512xf32> to vector<1x512xf32>
    %81 = vector.broadcast %80 : vector<1x512xf32> to vector<8x512xf32>
    %82 = arith.mulf %77, %81 : vector<8x512xf32>
    %c56_i32 = arith.constant 56 : i32
    %83 = tpu.dynamic_rotate %39 by %c56_i32 dim 1 : vector<8x512xf32>, i32 -> vector<8x512xf32>
    %84 = vector.extract_strided_slice %40 {offsets = [7, 0], sizes = [1, 512], strides = [1, 1]} : vector<32x512xf32> to vector<1x512xf32>
    %85 = vector.shape_cast %84 : vector<1x512xf32> to vector<512xf32>
    %86 = vector.shape_cast %85 : vector<512xf32> to vector<1x512xf32>
    %87 = vector.broadcast %86 : vector<1x512xf32> to vector<8x512xf32>
    %88 = arith.mulf %83, %87 : vector<8x512xf32>
    %c55_i32 = arith.constant 55 : i32
    %89 = tpu.dynamic_rotate %39 by %c55_i32 dim 1 : vector<8x512xf32>, i32 -> vector<8x512xf32>
    %90 = vector.extract_strided_slice %40 {offsets = [8, 0], sizes = [1, 512], strides = [1, 1]} : vector<32x512xf32> to vector<1x512xf32>
    %91 = vector.shape_cast %90 : vector<1x512xf32> to vector<512xf32>
    %92 = vector.shape_cast %91 : vector<512xf32> to vector<1x512xf32>
    %93 = vector.broadcast %92 : vector<1x512xf32> to vector<8x512xf32>
    %94 = arith.mulf %89, %93 : vector<8x512xf32>
    %c9_i32 = arith.constant 9 : i32
    %95 = tpu.dynamic_rotate %39 by %c9_i32 dim 1 : vector<8x512xf32>, i32 -> vector<8x512xf32>
    %96 = vector.extract_strided_slice %40 {offsets = [9, 0], sizes = [1, 512], strides = [1, 1]} : vector<32x512xf32> to vector<1x512xf32>
    %97 = vector.shape_cast %96 : vector<1x512xf32> to vector<512xf32>
    %98 = vector.shape_cast %97 : vector<512xf32> to vector<1x512xf32>
    %99 = vector.broadcast %98 : vector<1x512xf32> to vector<8x512xf32>
    %100 = arith.mulf %95, %99 : vector<8x512xf32>
    %c8_i32 = arith.constant 8 : i32
    %101 = tpu.dynamic_rotate %39 by %c8_i32 dim 1 : vector<8x512xf32>, i32 -> vector<8x512xf32>
    %102 = vector.extract_strided_slice %40 {offsets = [10, 0], sizes = [1, 512], strides = [1, 1]} : vector<32x512xf32> to vector<1x512xf32>
    %103 = vector.shape_cast %102 : vector<1x512xf32> to vector<512xf32>
    %104 = vector.shape_cast %103 : vector<512xf32> to vector<1x512xf32>
    %105 = vector.broadcast %104 : vector<1x512xf32> to vector<8x512xf32>
    %106 = arith.mulf %101, %105 : vector<8x512xf32>
    %c7_i32 = arith.constant 7 : i32
    %107 = tpu.dynamic_rotate %39 by %c7_i32 dim 1 : vector<8x512xf32>, i32 -> vector<8x512xf32>
    %108 = vector.extract_strided_slice %40 {offsets = [11, 0], sizes = [1, 512], strides = [1, 1]} : vector<32x512xf32> to vector<1x512xf32>
    %109 = vector.shape_cast %108 : vector<1x512xf32> to vector<512xf32>
    %110 = vector.shape_cast %109 : vector<512xf32> to vector<1x512xf32>
    %111 = vector.broadcast %110 : vector<1x512xf32> to vector<8x512xf32>
    %112 = arith.mulf %107, %111 : vector<8x512xf32>
    %c1_i32 = arith.constant 1 : i32
    %113 = tpu.dynamic_rotate %39 by %c1_i32 dim 1 : vector<8x512xf32>, i32 -> vector<8x512xf32>
    %114 = vector.extract_strided_slice %40 {offsets = [12, 0], sizes = [1, 512], strides = [1, 1]} : vector<32x512xf32> to vector<1x512xf32>
    %115 = vector.shape_cast %114 : vector<1x512xf32> to vector<512xf32>
    %116 = vector.shape_cast %115 : vector<512xf32> to vector<1x512xf32>
    %117 = vector.broadcast %116 : vector<1x512xf32> to vector<8x512xf32>
    %118 = arith.mulf %113, %117 : vector<8x512xf32>
    %c511_i32 = arith.constant 511 : i32
    %119 = tpu.dynamic_rotate %39 by %c511_i32 dim 1 : vector<8x512xf32>, i32 -> vector<8x512xf32>
    %120 = vector.extract_strided_slice %40 {offsets = [14, 0], sizes = [1, 512], strides = [1, 1]} : vector<32x512xf32> to vector<1x512xf32>
    %121 = vector.shape_cast %120 : vector<1x512xf32> to vector<512xf32>
    %122 = vector.shape_cast %121 : vector<512xf32> to vector<1x512xf32>
    %123 = vector.broadcast %122 : vector<1x512xf32> to vector<8x512xf32>
    %124 = arith.mulf %119, %123 : vector<8x512xf32>
    %c505_i32 = arith.constant 505 : i32
    %125 = tpu.dynamic_rotate %39 by %c505_i32 dim 1 : vector<8x512xf32>, i32 -> vector<8x512xf32>
    %126 = vector.extract_strided_slice %40 {offsets = [15, 0], sizes = [1, 512], strides = [1, 1]} : vector<32x512xf32> to vector<1x512xf32>
    %127 = vector.shape_cast %126 : vector<1x512xf32> to vector<512xf32>
    %128 = vector.shape_cast %127 : vector<512xf32> to vector<1x512xf32>
    %129 = vector.broadcast %128 : vector<1x512xf32> to vector<8x512xf32>
    %130 = arith.mulf %125, %129 : vector<8x512xf32>
    %c504_i32 = arith.constant 504 : i32
    %131 = tpu.dynamic_rotate %39 by %c504_i32 dim 1 : vector<8x512xf32>, i32 -> vector<8x512xf32>
    %132 = vector.extract_strided_slice %40 {offsets = [16, 0], sizes = [1, 512], strides = [1, 1]} : vector<32x512xf32> to vector<1x512xf32>
    %133 = vector.shape_cast %132 : vector<1x512xf32> to vector<512xf32>
    %134 = vector.shape_cast %133 : vector<512xf32> to vector<1x512xf32>
    %135 = vector.broadcast %134 : vector<1x512xf32> to vector<8x512xf32>
    %136 = arith.mulf %131, %135 : vector<8x512xf32>
    %c503_i32 = arith.constant 503 : i32
    %137 = tpu.dynamic_rotate %39 by %c503_i32 dim 1 : vector<8x512xf32>, i32 -> vector<8x512xf32>
    %138 = vector.extract_strided_slice %40 {offsets = [17, 0], sizes = [1, 512], strides = [1, 1]} : vector<32x512xf32> to vector<1x512xf32>
    %139 = vector.shape_cast %138 : vector<1x512xf32> to vector<512xf32>
    %140 = vector.shape_cast %139 : vector<512xf32> to vector<1x512xf32>
    %141 = vector.broadcast %140 : vector<1x512xf32> to vector<8x512xf32>
    %142 = arith.mulf %137, %141 : vector<8x512xf32>
    %c457_i32 = arith.constant 457 : i32
    %143 = tpu.dynamic_rotate %39 by %c457_i32 dim 1 : vector<8x512xf32>, i32 -> vector<8x512xf32>
    %144 = vector.extract_strided_slice %40 {offsets = [18, 0], sizes = [1, 512], strides = [1, 1]} : vector<32x512xf32> to vector<1x512xf32>
    %145 = vector.shape_cast %144 : vector<1x512xf32> to vector<512xf32>
    %146 = vector.shape_cast %145 : vector<512xf32> to vector<1x512xf32>
    %147 = vector.broadcast %146 : vector<1x512xf32> to vector<8x512xf32>
    %148 = arith.mulf %143, %147 : vector<8x512xf32>
    %c456_i32 = arith.constant 456 : i32
    %149 = tpu.dynamic_rotate %39 by %c456_i32 dim 1 : vector<8x512xf32>, i32 -> vector<8x512xf32>
    %150 = vector.extract_strided_slice %40 {offsets = [19, 0], sizes = [1, 512], strides = [1, 1]} : vector<32x512xf32> to vector<1x512xf32>
    %151 = vector.shape_cast %150 : vector<1x512xf32> to vector<512xf32>
    %152 = vector.shape_cast %151 : vector<512xf32> to vector<1x512xf32>
    %153 = vector.broadcast %152 : vector<1x512xf32> to vector<8x512xf32>
    %154 = arith.mulf %149, %153 : vector<8x512xf32>
    %c455_i32 = arith.constant 455 : i32
    %155 = tpu.dynamic_rotate %39 by %c455_i32 dim 1 : vector<8x512xf32>, i32 -> vector<8x512xf32>
    %156 = vector.extract_strided_slice %40 {offsets = [20, 0], sizes = [1, 512], strides = [1, 1]} : vector<32x512xf32> to vector<1x512xf32>
    %157 = vector.shape_cast %156 : vector<1x512xf32> to vector<512xf32>
    %158 = vector.shape_cast %157 : vector<512xf32> to vector<1x512xf32>
    %159 = vector.broadcast %158 : vector<1x512xf32> to vector<8x512xf32>
    %160 = arith.mulf %155, %159 : vector<8x512xf32>
    %c449_i32 = arith.constant 449 : i32
    %161 = tpu.dynamic_rotate %39 by %c449_i32 dim 1 : vector<8x512xf32>, i32 -> vector<8x512xf32>
    %162 = vector.extract_strided_slice %40 {offsets = [21, 0], sizes = [1, 512], strides = [1, 1]} : vector<32x512xf32> to vector<1x512xf32>
    %163 = vector.shape_cast %162 : vector<1x512xf32> to vector<512xf32>
    %164 = vector.shape_cast %163 : vector<512xf32> to vector<1x512xf32>
    %165 = vector.broadcast %164 : vector<1x512xf32> to vector<8x512xf32>
    %166 = arith.mulf %161, %165 : vector<8x512xf32>
    %c448_i32 = arith.constant 448 : i32
    %167 = tpu.dynamic_rotate %39 by %c448_i32 dim 1 : vector<8x512xf32>, i32 -> vector<8x512xf32>
    %168 = vector.extract_strided_slice %40 {offsets = [22, 0], sizes = [1, 512], strides = [1, 1]} : vector<32x512xf32> to vector<1x512xf32>
    %169 = vector.shape_cast %168 : vector<1x512xf32> to vector<512xf32>
    %170 = vector.shape_cast %169 : vector<512xf32> to vector<1x512xf32>
    %171 = vector.broadcast %170 : vector<1x512xf32> to vector<8x512xf32>
    %172 = arith.mulf %167, %171 : vector<8x512xf32>
    %c447_i32 = arith.constant 447 : i32
    %173 = tpu.dynamic_rotate %39 by %c447_i32 dim 1 : vector<8x512xf32>, i32 -> vector<8x512xf32>
    %174 = vector.extract_strided_slice %40 {offsets = [23, 0], sizes = [1, 512], strides = [1, 1]} : vector<32x512xf32> to vector<1x512xf32>
    %175 = vector.shape_cast %174 : vector<1x512xf32> to vector<512xf32>
    %176 = vector.shape_cast %175 : vector<512xf32> to vector<1x512xf32>
    %177 = vector.broadcast %176 : vector<1x512xf32> to vector<8x512xf32>
    %178 = arith.mulf %173, %177 : vector<8x512xf32>
    %c441_i32 = arith.constant 441 : i32
    %179 = tpu.dynamic_rotate %39 by %c441_i32 dim 1 : vector<8x512xf32>, i32 -> vector<8x512xf32>
    %180 = vector.extract_strided_slice %40 {offsets = [24, 0], sizes = [1, 512], strides = [1, 1]} : vector<32x512xf32> to vector<1x512xf32>
    %181 = vector.shape_cast %180 : vector<1x512xf32> to vector<512xf32>
    %182 = vector.shape_cast %181 : vector<512xf32> to vector<1x512xf32>
    %183 = vector.broadcast %182 : vector<1x512xf32> to vector<8x512xf32>
    %184 = arith.mulf %179, %183 : vector<8x512xf32>
    %c440_i32 = arith.constant 440 : i32
    %185 = tpu.dynamic_rotate %39 by %c440_i32 dim 1 : vector<8x512xf32>, i32 -> vector<8x512xf32>
    %186 = vector.extract_strided_slice %40 {offsets = [25, 0], sizes = [1, 512], strides = [1, 1]} : vector<32x512xf32> to vector<1x512xf32>
    %187 = vector.shape_cast %186 : vector<1x512xf32> to vector<512xf32>
    %188 = vector.shape_cast %187 : vector<512xf32> to vector<1x512xf32>
    %189 = vector.broadcast %188 : vector<1x512xf32> to vector<8x512xf32>
    %190 = arith.mulf %185, %189 : vector<8x512xf32>
    %c439_i32 = arith.constant 439 : i32
    %191 = tpu.dynamic_rotate %39 by %c439_i32 dim 1 : vector<8x512xf32>, i32 -> vector<8x512xf32>
    %192 = vector.extract_strided_slice %40 {offsets = [26, 0], sizes = [1, 512], strides = [1, 1]} : vector<32x512xf32> to vector<1x512xf32>
    %193 = vector.shape_cast %192 : vector<1x512xf32> to vector<512xf32>
    %194 = vector.shape_cast %193 : vector<512xf32> to vector<1x512xf32>
    %195 = vector.broadcast %194 : vector<1x512xf32> to vector<8x512xf32>
    %196 = arith.mulf %191, %195 : vector<8x512xf32>
    %197 = tpu.concatenate %46, %52, %58, %64, %70, %76, %82, %88, %94, %100, %106, %112, %118, %39, %124, %130 in 0 : vector<8x512xf32>, vector<8x512xf32>, vector<8x512xf32>, vector<8x512xf32>, vector<8x512xf32>, vector<8x512xf32>, vector<8x512xf32>, vector<8x512xf32>, vector<8x512xf32>, vector<8x512xf32>, vector<8x512xf32>, vector<8x512xf32>, vector<8x512xf32>, vector<8x512xf32>, vector<8x512xf32>, vector<8x512xf32> -> vector<128x512xf32>
    %198 = tpu.concatenate %136, %142, %148, %154, %160, %166, %172, %178, %184, %190, %196 in 0 : vector<8x512xf32>, vector<8x512xf32>, vector<8x512xf32>, vector<8x512xf32>, vector<8x512xf32>, vector<8x512xf32>, vector<8x512xf32>, vector<8x512xf32>, vector<8x512xf32>, vector<8x512xf32>, vector<8x512xf32> -> vector<88x512xf32>
    %199 = tpu.concatenate %197, %198 in 0 : vector<128x512xf32>, vector<88x512xf32> -> vector<216x512xf32>
    %c0_16 = arith.constant 0 : index
    %c0_17 = arith.constant 0 : index
    %200 = vector.load %arg3[%c0_16, %c0_17] : memref<8x216xf32, #tpu.memory_space<vmem>>, vector<8x216xf32>
    %cst_18 = arith.constant dense<0.000000e+00> : vector<8x512xf32>
    %201 = tpu.matmul %200, %199, %cst_18 {dimension_numbers = #tpu.dot_dimension_numbers<[1], [0], [0], [1], [0, 0, 1, 1], [], []>} : vector<8x216xf32>, vector<216x512xf32>, vector<8x512xf32> -> vector<8x512xf32>
    %cst_19 = arith.constant dense<0.000000e+00> : vector<8xf32>
    %202 = vector.multi_reduction <add>, %201, %cst_19 [1] : vector<8x512xf32> to vector<8xf32>
    %203 = vector.shape_cast %202 : vector<8xf32> to vector<8x1xf32>
    %cst_20 = arith.constant 0.001953125 : f32
    %204 = vector.broadcast %cst_20 : f32 to vector<8x1xf32>
    %205 = arith.mulf %203, %204 : vector<8x1xf32>
    %206 = arith.mulf %201, %201 : vector<8x512xf32>
    %cst_21 = arith.constant dense<0.000000e+00> : vector<8xf32>
    %207 = vector.multi_reduction <add>, %206, %cst_21 [1] : vector<8x512xf32> to vector<8xf32>
    %208 = vector.shape_cast %207 : vector<8xf32> to vector<8x1xf32>
    %cst_22 = arith.constant 0.001953125 : f32
    %209 = vector.broadcast %cst_22 : f32 to vector<8x1xf32>
    %210 = arith.mulf %208, %209 : vector<8x1xf32>
    %211 = arith.mulf %205, %205 : vector<8x1xf32>
    %212 = arith.subf %210, %211 : vector<8x1xf32>
    %cst_23 = arith.constant 0.000000e+00 : f32
    %213 = vector.broadcast %cst_23 : f32 to vector<8x1xf32>
    %214 = arith.maximumf %212, %213 : vector<8x1xf32>
    %215 = vector.broadcast %205 : vector<8x1xf32> to vector<8x512xf32>
    %216 = arith.subf %201, %215 : vector<8x512xf32>
    %cst_24 = arith.constant 9.99999974E-6 : f32
    %217 = vector.broadcast %cst_24 : f32 to vector<8x1xf32>
    %218 = arith.addf %214, %217 : vector<8x1xf32>
    %219 = math.rsqrt %218 : vector<8x1xf32>
    %220 = vector.broadcast %219 : vector<8x1xf32> to vector<8x512xf32>
    %221 = arith.mulf %216, %220 : vector<8x512xf32>
    %222 = vector.broadcast %3 : vector<8x1xf32> to vector<8x512xf32>
    %223 = arith.mulf %221, %222 : vector<8x512xf32>
    %224 = vector.broadcast %4 : vector<8x1xf32> to vector<8x512xf32>
    %225 = arith.addf %223, %224 : vector<8x512xf32>
    %cst_25 = arith.constant 0.000000e+00 : f32
    %226 = vector.broadcast %cst_25 : f32 to vector<8x512xf32>
    %227 = arith.cmpf oge, %225, %226 : vector<8x512xf32>
    %cst_26 = arith.constant 0.00999999977 : f32
    %228 = vector.broadcast %cst_26 : f32 to vector<8x512xf32>
    %229 = arith.mulf %228, %225 : vector<8x512xf32>
    %230 = arith.select %227, %225, %229 : vector<8x512xi1>, vector<8x512xf32>
    %c0_27 = arith.constant 0 : index
    %c0_28 = arith.constant 0 : index
    %231 = vector.load %arg4[%c0_27, %c0_28] : memref<16x8xf32, #tpu.memory_space<vmem>>, vector<16x8xf32>
    %cst_29 = arith.constant dense<0.000000e+00> : vector<16x512xf32>
    %232 = tpu.matmul %231, %230, %cst_29 {dimension_numbers = #tpu.dot_dimension_numbers<[1], [0], [0], [1], [0, 0, 1, 1], [], []>} : vector<16x8xf32>, vector<8x512xf32>, vector<16x512xf32> -> vector<16x512xf32>
    %cst_30 = arith.constant dense<0.000000e+00> : vector<16xf32>
    %233 = vector.multi_reduction <add>, %232, %cst_30 [1] : vector<16x512xf32> to vector<16xf32>
    %234 = vector.shape_cast %233 : vector<16xf32> to vector<16x1xf32>
    %cst_31 = arith.constant 0.001953125 : f32
    %235 = vector.broadcast %cst_31 : f32 to vector<16x1xf32>
    %236 = arith.mulf %234, %235 : vector<16x1xf32>
    %237 = arith.mulf %232, %232 : vector<16x512xf32>
    %cst_32 = arith.constant dense<0.000000e+00> : vector<16xf32>
    %238 = vector.multi_reduction <add>, %237, %cst_32 [1] : vector<16x512xf32> to vector<16xf32>
    %239 = vector.shape_cast %238 : vector<16xf32> to vector<16x1xf32>
    %cst_33 = arith.constant 0.001953125 : f32
    %240 = vector.broadcast %cst_33 : f32 to vector<16x1xf32>
    %241 = arith.mulf %239, %240 : vector<16x1xf32>
    %242 = arith.mulf %236, %236 : vector<16x1xf32>
    %243 = arith.subf %241, %242 : vector<16x1xf32>
    %cst_34 = arith.constant 0.000000e+00 : f32
    %244 = vector.broadcast %cst_34 : f32 to vector<16x1xf32>
    %245 = arith.maximumf %243, %244 : vector<16x1xf32>
    %246 = vector.broadcast %236 : vector<16x1xf32> to vector<16x512xf32>
    %247 = arith.subf %232, %246 : vector<16x512xf32>
    %cst_35 = arith.constant 9.99999974E-6 : f32
    %248 = vector.broadcast %cst_35 : f32 to vector<16x1xf32>
    %249 = arith.addf %245, %248 : vector<16x1xf32>
    %250 = math.rsqrt %249 : vector<16x1xf32>
    %251 = vector.broadcast %250 : vector<16x1xf32> to vector<16x512xf32>
    %252 = arith.mulf %247, %251 : vector<16x512xf32>
    %253 = vector.broadcast %5 : vector<16x1xf32> to vector<16x512xf32>
    %254 = arith.mulf %252, %253 : vector<16x512xf32>
    %255 = vector.broadcast %6 : vector<16x1xf32> to vector<16x512xf32>
    %256 = arith.addf %254, %255 : vector<16x512xf32>
    %257 = arith.extf %8 : vector<16x512xbf16> to vector<16x512xf32>
    %258 = arith.addf %256, %257 : vector<16x512xf32>
    %cst_36 = arith.constant 0.000000e+00 : f32
    %259 = vector.broadcast %cst_36 : f32 to vector<16x512xf32>
    %260 = arith.cmpf oge, %258, %259 : vector<16x512xf32>
    %cst_37 = arith.constant 0.00999999977 : f32
    %261 = vector.broadcast %cst_37 : f32 to vector<16x512xf32>
    %262 = arith.mulf %261, %258 : vector<16x512xf32>
    %263 = arith.select %260, %258, %262 : vector<16x512xi1>, vector<16x512xf32>
    %c0_38 = arith.constant 0 : index
    %c0_39 = arith.constant 0 : index
    %c0_40 = arith.constant 0 : index
    %264 = vector.load %arg7[%c0_38, %c0_39, %c0_40] : memref<1x16x512xf32, #tpu.memory_space<vmem>>, vector<1x16x512xf32>
    %265 = vector.shape_cast %264 : vector<1x16x512xf32> to vector<16x512xf32>
    %266 = vector.shape_cast %263 : vector<16x512xf32> to vector<1x16x512xf32>
    tpu.vector_store %arg7[%c0_38, %c0_39, %c0_40], %266 {strides = array<i32>} : memref<1x16x512xf32, #tpu.memory_space<vmem>>, vector<1x16x512xf32>,
    return
  }
  func.func @transform_0(%arg0: i32) -> (i32, i32, i32) {
    %c0_i32 = arith.constant 0 : i32
    %c0_i32_0 = arith.constant 0 : i32
    %c0_i32_1 = arith.constant 0 : i32
    return %arg0, %c0_i32, %c0_i32_0 : i32, i32, i32
  }
  func.func @transform_1(%arg0: i32) -> (i32, i32) {
    %c0_i32 = arith.constant 0 : i32
    %c0_i32_0 = arith.constant 0 : i32
    %c0_i32_1 = arith.constant 0 : i32
    return %c0_i32, %c0_i32_0 : i32, i32
  }
  func.func @transform_2(%arg0: i32) -> (i32, i32) {
    %c0_i32 = arith.constant 0 : i32
    %c0_i32_0 = arith.constant 0 : i32
    %c0_i32_1 = arith.constant 0 : i32
    return %c0_i32, %c0_i32_0 : i32, i32
  }
  func.func @transform_3(%arg0: i32) -> (i32, i32) {
    %c0_i32 = arith.constant 0 : i32
    %c0_i32_0 = arith.constant 0 : i32
    %c0_i32_1 = arith.constant 0 : i32
    return %c0_i32, %c0_i32_0 : i32, i32
  }
  func.func @transform_4(%arg0: i32) -> (i32, i32) {
    %c0_i32 = arith.constant 0 : i32
    %c0_i32_0 = arith.constant 0 : i32
    %c0_i32_1 = arith.constant 0 : i32
    return %c0_i32, %c0_i32_0 : i32, i32
  }
  func.func @transform_5(%arg0: i32) -> (i32, i32) {
    %c0_i32 = arith.constant 0 : i32
    %c0_i32_0 = arith.constant 0 : i32
    %c0_i32_1 = arith.constant 0 : i32
    return %c0_i32, %c0_i32_0 : i32, i32
  }
  func.func @transform_6(%arg0: i32) -> (i32, i32, i32) {
    %c0_i32 = arith.constant 0 : i32
    %c0_i32_0 = arith.constant 0 : i32
    %c0_i32_1 = arith.constant 0 : i32
    return %arg0, %c0_i32, %c0_i32_0 : i32, i32, i32
  }
}

</mosaic_0001>

<bundles_post_ra>
// kernel: bottleneck_3d.1
= control target key start
LH: loop header
LB: loop body
LE: loop exit
PB: predicated region body
PF: predicated region fallthrough
CT: control target
= control target key end

     0   :  { %s1894_s21 = smov 0   ;;  %s2848_s0 = inlined_call_operand.vmem [shape: bf16[2,16,512], index: 0, kind: input, shape index: {}]   ;;  %s2849_s1 = inlined_call_operand.vmem [shape: bf16[8,16], index: 1, kind: input, shape index: {}]   ;;  %s2850_s2 = inlined_call_operand.vmem [shape: f32[8,216], index: 2, kind: input, shape index: {}]   ;;  %s2851_s3 = inlined_call_operand.vmem [shape: f32[16,8], index: 3, kind: input, shape index: {}]   ;;  %s2852_s4 = inlined_call_operand.vmem [shape: f32[16,8], index: 4, kind: input, shape index: {}]   ;;  %s2853_s5 = inlined_call_operand.vmem [shape: f32[32,512], index: 5, kind: input, shape index: {}]   ;;  %s2854_s6 = inlined_call_operand.vmem [shape: f32[2,16,512], index: 6, kind: output, shape index: {}]  }
   0x1 LB: > { %s1745_s22 = sadd.s32 4294967295, %s1833_s21   ;;  %p1749_p0 = scmp.ge.s32.totalorder %s1833_s21, 1  ;;  %s1833_s21 = sphi %s1894_s21, %s16_s21  }
   0x2   : > { %p212_p1 = scmp.lt.s32.totalorder %s1833_s21, 3 }
   0x4   : > { %p213_p2 = pnand %p1749_p0, %p212_p1 }
   0x6   : > { %216 = sbr.rel (%p213_p2) target bundleno = 1475 (0x5c3), region = 44 }
   0xb   : > { %p242_p3 = scmp.lt.s32.totalorder %s1745_s22, 1  ;;  %v1835_v0 = vmov 0   ;;  %v259_v9 = vld [vmem:[%s2849_s1] sm:$0xf]  ;;  %vm280_vm0 = vcmask 130048   ;;  %v1836_v11 = vmov 1  }
   0xc   : > { %316 = vmatprep.mubr.bf16.mxu0 %v1835_v0  ;;  %357 = vmatprep.mubr.bf16.mxu1 %v1835_v0  ;;  %v253_v10 = vld [vmem:[%s2852_s4] sm:$0xff]  ;;  %s1837_s7 = smov 121   ;;  %s1838_s8 = smov 1   ;;  %vm1185_vm7 = vcmask 719872  }
   0xd   : > { %s2898_s22 = smov (!%p242_p3, %s1745_s22), 1  ;;  %1802 = vset.pattern.permute.xlu1 %v1835_v0  ;;  %s1839_s9 = smov 127  }
   0xe   : > { %s1768_s23 = sshll.u32 %s2898_s22, 5  ;;  %397 = vperm.xlu1 %1802, %v253_v10   ;;  %s1840_s10 = smov 7  }
   0xf   : > { %s1908_s26 = scalar_lea.vmem %s2848_s0, %s1768_s23  ;;  %s1841_s11 = smov 8  }
  0x10   : > { %v255_v1 = vld [vmem:[%s1908_s26] sm:$0xff]  ;;  %v257_v2 = vld [vmem:[%s1908_s26 + $0x10] sm:$0xff]  ;;  %v256_v3 = vld [vmem:[%s1908_s26 + $0x8] sm:$0xff]  ;;  %s1842_s12 = smov 9   ;;  %s1843_s13 = smov 55  }
  0x11   : > { %v1755_v4 = vcombine.high %v255_v1, %v257_v2  ;;  %v258_v5 = vld [vmem:[%s1908_s26 + $0x18] sm:$0xff]  ;;  %v1754_v7 = vcombine.low %v255_v1, %v257_v2  ;;  %s1844_s14 = smov 56   ;;  %s1845_s15 = smov 57   ;;  %v448_v1 = vlaneseq }
  0x12   : > { %v1757_v6 = vcombine.high %v256_v3, %v258_v5  ;;  %v1756_v8 = vcombine.low %v256_v3, %v258_v5  ;;  %1803 = vset.pattern.permute.xlu1 %v1836_v11  ;;  %s1846_s16 = smov 63   ;;  %s1847_s17 = smov 64   ;;  %v2000_v5 = vld [vmem:[%s2853_s5 + $0x28] sm:$0xff] }
  0x13   : > { %298 = vmatprep.subr.bf16.mxu0 %v1755_v4  ;;  %405 = vperm.xlu1 %1803, %v253_v10   ;;  %s1848_s18 = smov 65   ;;  %s1849_s19 = smov 71   ;;  %v1987_v2 = vshrl.u32 %v448_v1, 7  ;;  %v1992_v3 = vand.u32 127, %v448_v1 }
  0x14   : > { %339 = vmatprep.subr.bf16.mxu1 %v1757_v6  ;;  %299 = vmatpush1.bf16.msra.mxu0 %v1754_v7  ;;  %s1850_s20 = smov 72   ;;  %s1851_s23 = smov 73   ;;  %v2011_v7 = vld [vmem:[%s2853_s5 + $0x20] sm:$0xff] }
  0x15   : > { %340 = vmatpush1.bf16.msra.mxu1 %v1756_v8  ;;  %v1995_v4 = vsub.s32 7, %v1987_v2  ;;  %s1852_s27 = smov 119   ;;  %vm912_vm5 = vcmp.lt.s32.totalorder %v1992_v3, 121  ;;  %s1853_s30 = smov 120   ;;  %vm879_vm6 = vcmp.lt.s32.totalorder %v1992_v3, 127  ;;  %vm846_vm8 = vcmp.lt.s32.totalorder %v1992_v3, 1 }
  0x16   : > { %vm813_vm9 = vcmp.lt.s32.totalorder %v1992_v3, 7  ;;  %vm780_vm10 = vcmp.lt.s32.totalorder %v1992_v3, 8  ;;  %vm747_vm11 = vcmp.lt.s32.totalorder %v1992_v3, 9  ;;  %vm714_vm12 = vcmp.lt.s32.totalorder %v1992_v3, 55  ;;  %s1769_s29 = sshll.u32 %s2898_s22, 6 }
  0x17   : > { %1758 = vmatmul.mubr.msk.bf16.vlgmr.msra.gmra.mxu0 %vm280_vm0, %v259_v9  ;;  %v924_v6 = vrot.slane %v2000_v5, %v1995_v4  ;;  %vm681_vm13 = vcmp.lt.s32.totalorder %v1992_v3, 56  ;;  %vm648_vm14 = vcmp.lt.s32.totalorder %v1992_v3, 57  ;;  %vm615_vm15 = vcmp.lt.s32.totalorder %v1992_v3, 63 }
  0x18   : > { %1759 = vmatmul.mubr.msk.bf16.vlgmr.msra.gmra.mxu1 %vm280_vm0, %v259_v9  ;;  %vm582_vm0 = vcmp.lt.s32.totalorder %v1992_v3, 64 }
  0x89   : > { %v398_v38 = vpop.permute.xlu1 %397 }
  0x8e   : > { %v406_v48 = vpop.permute.xlu1 %405 }
  0xd7   : > { %v318_v12 = vpop.f32.mrf.mxu0 }
  0xd8   : > { %v359_v13 = vpop.f32.mrf.mxu1  ;;  %v372_v16 = vmul.f32 %v318_v12, %v318_v12 }
  0xd9   : > { %v320_v14 = vpop.f32.mrf.mxu0  ;;  %v374_v17 = vmul.f32 %v359_v13, %v359_v13 }
  0xda   : > { %v361_v15 = vpop.f32.mrf.mxu1  ;;  %v366_v18 = vadd.f32 %v320_v14, %v318_v12  ;;  %v373_v19 = vmul.f32 %v320_v14, %v320_v14 }
  0xdb   : > { %v322_v20 = vpop.f32.mrf.mxu0  ;;  %v375_v28 = vmul.f32 %v361_v15, %v361_v15 }
  0xdc   : > { %v363_v21 = vpop.f32.mrf.mxu1  ;;  %v367_v22 = vadd.f32 %v366_v18, %v359_v13  ;;  %v376_v23 = vadd.f32 %v373_v19, %v372_v16 }
  0xdd   : > { %v323_v24 = vpop.f32.mrf.mxu0 }
  0xde   : > { %v364_v25 = vpop.f32.mrf.mxu1  ;;  %v368_v26 = vadd.f32 %v367_v22, %v361_v15  ;;  %v377_v27 = vadd.f32 %v376_v23, %v374_v17  ;;  %v2029_v17 = vsub.s32 6, %v1987_v2 }
  0xe0   : > { %369 = vadd.xlane.f32.xlu0 %v368_v26  ;;  %v378_v29 = vadd.f32 %v377_v27, %v375_v28  ;;  %v891_v20 = vrot.slane %v2000_v5, %v2029_v17  ;;  %v887_v25 = vrot.slane %v2011_v7, %v2029_v17  ;;  %v2051_v28 = vld [vmem:[%s2853_s5 + $0x30] sm:$0xff] }
  0xe4   : > { %379 = vadd.xlane.f32.xlu0 %v378_v29  ;;  %v2056_v29 = vld [vmem:[%s2853_s5 + $0x38] sm:$0xff] }
 0x169   : > { %v370_v30 = vpop.xlane.xlu0 %369 }
 0x16a   : > { %v371_v31 = vmul.f32 0.001953125, %v370_v30 }
 0x16c   : > { %v382_v33 = vmul.f32 %v371_v31, %v371_v31  ;;  %v385_v39 = vsub.f32 %v318_v12, %v371_v31  ;;  %v386_v40 = vsub.f32 %v320_v14, %v371_v31  ;;  %v387_v41 = vsub.f32 %v359_v13, %v371_v31 }
 0x16d   : > { %v380_v32 = vpop.xlane.xlu0 %379  ;;  %v388_v43 = vsub.f32 %v361_v15, %v371_v31  ;;  %v920_v12 = vrot.slane %v2011_v7, %v1995_v4  ;;  %v2061_v31 = vsub.s32 4, %v1987_v2 }
 0x16e   : > { %v381_v34 = vmul.f32 0.001953125, %v380_v32 }
 0x170   : > { %v383_v35 = vsub.f32 %v381_v34, %v382_v33  ;;  %v928_v33 = vrot.slane %v2051_v28, %v1995_v4  ;;  %v932_v34 = vrot.slane %v2056_v29, %v1995_v4 }
 0x172   : > { %v384_v36 = vmax.f32 %v383_v35, 0.0  ;;  %v1184_v35 = vld [vmem:[%s2850_s2 + $0x8] sm:$0xff] }
 0x173   : > { %1760 = vmatprep.mubr.msk.f32.mxu0 %vm1185_vm7, %v1184_v35  ;;  %1761 = vmatprep.mubr.msk.f32.mxu1 %vm1185_vm7, %v1184_v35 }
 0x174   : > { %v389_v37 = vadd.f32 1e-05, %v384_v36  ;;  %v895_v36 = vrot.slane %v2051_v28, %v2029_v17 }
 0x176   : > { %1814 = vrsqrt.f32 %v389_v37  ;;  %v899_v37 = vrot.slane %v2056_v29, %v2029_v17 }
 0x183   : > { %v1815_v42 = vpop.eup %1814 }
 0x184   : > { %v391_v44 = vmul.f32 %v1815_v42, %v385_v39  ;;  %v392_v45 = vmul.f32 %v1815_v42, %v386_v40  ;;  %v393_v46 = vmul.f32 %v1815_v42, %v387_v41  ;;  %v394_v47 = vmul.f32 %v1815_v42, %v388_v43 }
 0x185   : > { %v858_v43 = vrot.slane %v2000_v5, %v2061_v31 }
 0x186   : > { %v400_v49 = vmul.f32 %v398_v38, %v391_v44  ;;  %v401_v50 = vmul.f32 %v398_v38, %v392_v45  ;;  %v402_v51 = vmul.f32 %v398_v38, %v393_v46  ;;  %v403_v54 = vmul.f32 %v398_v38, %v394_v47 }
 0x188   : > { %v409_v52 = vadd.f32 %v406_v48, %v401_v50  ;;  %v410_v53 = vadd.f32 %v406_v48, %v402_v51  ;;  %v408_v55 = vadd.f32 %v406_v48, %v400_v49  ;;  %v411_v58 = vadd.f32 %v406_v48, %v403_v54 }
 0x189   : > { %v2103_v54 = vsub.s32 3, %v1987_v2 }
 0x18a   : > { %vm413_vm1 = vcmp.ge.f32.partialorder %v409_v52, 0.0  ;;  %vm414_vm2 = vcmp.ge.f32.partialorder %v410_v53, 0.0  ;;  %v417_v56 = vmul.f32 0.01, %v409_v52  ;;  %v418_v57 = vmul.f32 0.01, %v410_v53 }
 0x18b   : > { %v416_v59 = vmul.f32 0.01, %v408_v55  ;;  %vm412_vm3 = vcmp.ge.f32.partialorder %v408_v55, 0.0  ;;  %v419_v62 = vmul.f32 0.01, %v411_v58  ;;  %vm415_vm4 = vcmp.ge.f32.partialorder %v411_v58, 0.0 }
 0x18c   : > { %v1920_v60 = vsel %vm413_vm1, %v409_v52, %v417_v56  ;;  %v1922_v61 = vsel %vm414_vm2, %v410_v53, %v418_v57  ;;  %v854_v53 = vrot.slane %v2011_v7, %v2061_v31  ;;  %vm549_vm1 = vcmp.lt.s32.totalorder %v1992_v3, 65 }
 0x18d   : > { %908 = vrot.lane.b32.xlu1 %v1922_v61, %s1837_s7  ;;  %906 = vrot.lane.b32.xlu0 %v1920_v60, %s1837_s7  ;;  %v1926_v63 = vsel %vm412_vm3, %v408_v55, %v416_v59  ;;  %v1930_v0 = vsel %vm415_vm4, %v411_v58, %v419_v62  ;;  %v825_v59 = vrot.slane %v2000_v5, %v2103_v54  ;;  %vm516_vm2 = vcmp.lt.s32.totalorder %v1992_v3, 71 }
 0x18e   : > { %v821_v62 = vrot.slane %v2011_v7, %v2103_v54  ;;  %vm483_vm3 = vcmp.lt.s32.totalorder %v1992_v3, 72  ;;  %vm450_vm4 = vcmp.lt.s32.totalorder %v1992_v3, 73 }
 0x191   : > { %838 = vrot.lane.b32.xlu0 %v1926_v63, %s1838_s8  ;;  %904 = vrot.lane.b32.xlu1 %v1926_v63, %s1837_s7 }
 0x195   : > { %877 = vrot.lane.b32.xlu0 %v1930_v0, %s1839_s9  ;;  %873 = vrot.lane.b32.xlu1 %v1920_v60, %s1839_s9 }
 0x199   : > { %805 = vrot.lane.b32.xlu0 %v1926_v63, %s1840_s10  ;;  %875 = vrot.lane.b32.xlu1 %v1922_v61, %s1839_s9 }
 0x19d   : > { %811 = vrot.lane.b32.xlu0 %v1930_v0, %s1840_s10  ;;  %871 = vrot.lane.b32.xlu1 %v1926_v63, %s1839_s9 }
 0x1a1   : > { %774 = vrot.lane.b32.xlu0 %v1920_v60, %s1841_s11  ;;  %910 = vrot.lane.b32.xlu1 %v1930_v0, %s1837_s7 }
 0x1a5   : > { %778 = vrot.lane.b32.xlu0 %v1930_v0, %s1841_s11  ;;  %840 = vrot.lane.b32.xlu1 %v1920_v60, %s1838_s8 }
 0x1a9   : > { %741 = vrot.lane.b32.xlu0 %v1920_v60, %s1842_s12  ;;  %844 = vrot.lane.b32.xlu1 %v1930_v0, %s1838_s8 }
 0x1ad   : > { %745 = vrot.lane.b32.xlu0 %v1930_v0, %s1842_s12  ;;  %807 = vrot.lane.b32.xlu1 %v1920_v60, %s1840_s10 }
 0x1b1   : > { %708 = vrot.lane.b32.xlu0 %v1920_v60, %s1843_s13  ;;  %772 = vrot.lane.b32.xlu1 %v1926_v63, %s1841_s11 }
 0x1b5   : > { %712 = vrot.lane.b32.xlu0 %v1930_v0, %s1843_s13  ;;  %842 = vrot.lane.b32.xlu1 %v1922_v61, %s1838_s8  ;;  %s2829_s8 = scalar_lea.vmem %s2854_s6, %s1769_s29 }
 0x1b9   : > { %675 = vrot.lane.b32.xlu0 %v1920_v60, %s1844_s14  ;;  %739 = vrot.lane.b32.xlu1 %v1926_v63, %s1842_s12 }
 0x1bd   : > { %679 = vrot.lane.b32.xlu0 %v1930_v0, %s1844_s14  ;;  %809 = vrot.lane.b32.xlu1 %v1922_v61, %s1840_s10 }
 0x1c1   : > { %642 = vrot.lane.b32.xlu0 %v1920_v60, %s1845_s15  ;;  %706 = vrot.lane.b32.xlu1 %v1926_v63, %s1843_s13 }
 0x1c5   : > { %646 = vrot.lane.b32.xlu0 %v1930_v0, %s1845_s15  ;;  %776 = vrot.lane.b32.xlu1 %v1922_v61, %s1841_s11 }
 0x1c9   : > { %609 = vrot.lane.b32.xlu0 %v1920_v60, %s1846_s16  ;;  %673 = vrot.lane.b32.xlu1 %v1926_v63, %s1844_s14 }
 0x1cd   : > { %613 = vrot.lane.b32.xlu0 %v1930_v0, %s1846_s16  ;;  %743 = vrot.lane.b32.xlu1 %v1922_v61, %s1842_s12 }
 0x1d1   : > { %576 = vrot.lane.b32.xlu0 %v1920_v60, %s1847_s17  ;;  %640 = vrot.lane.b32.xlu1 %v1926_v63, %s1845_s15 }
 0x1d5   : > { %580 = vrot.lane.b32.xlu0 %v1930_v0, %s1847_s17  ;;  %710 = vrot.lane.b32.xlu1 %v1922_v61, %s1843_s13 }
 0x1d9   : > { %543 = vrot.lane.b32.xlu0 %v1920_v60, %s1848_s18  ;;  %607 = vrot.lane.b32.xlu1 %v1926_v63, %s1846_s16 }
 0x1dd   : > { %547 = vrot.lane.b32.xlu0 %v1930_v0, %s1848_s18  ;;  %677 = vrot.lane.b32.xlu1 %v1922_v61, %s1844_s14 }
 0x1e1   : > { %510 = vrot.lane.b32.xlu0 %v1920_v60, %s1849_s19  ;;  %574 = vrot.lane.b32.xlu1 %v1926_v63, %s1847_s17 }
 0x1e5   : > { %514 = vrot.lane.b32.xlu0 %v1930_v0, %s1849_s19  ;;  %644 = vrot.lane.b32.xlu1 %v1922_v61, %s1845_s15 }
 0x1e9   : > { %477 = vrot.lane.b32.xlu0 %v1920_v60, %s1850_s20  ;;  %541 = vrot.lane.b32.xlu1 %v1926_v63, %s1848_s18 }
 0x1ed   : > { %481 = vrot.lane.b32.xlu0 %v1930_v0, %s1850_s20  ;;  %611 = vrot.lane.b32.xlu1 %v1922_v61, %s1846_s16 }
 0x1f1   : > { %442 = vrot.lane.b32.xlu0 %v1920_v60, %s1851_s23  ;;  %508 = vrot.lane.b32.xlu1 %v1926_v63, %s1849_s19 }
 0x1f5   : > { %446 = vrot.lane.b32.xlu0 %v1930_v0, %s1851_s23  ;;  %578 = vrot.lane.b32.xlu1 %v1922_v61, %s1847_s17 }
 0x1f9   : > { %444 = vrot.lane.b32.xlu0 %v1922_v61, %s1851_s23  ;;  %475 = vrot.lane.b32.xlu1 %v1926_v63, %s1850_s20 }
 0x1fd   : > { %974 = vrot.lane.b32.xlu0 %v1922_v61, %s1852_s27  ;;  %545 = vrot.lane.b32.xlu1 %v1922_v61, %s1848_s18 }
 0x1ff   : > { %v909_v8 = vpop.permute.xlu1 %908  ;;  %v907_v9 = vpop.permute.xlu0 %906 }
 0x200   : > { %v914_v10 = vsel %vm912_vm5, %v907_v9, %v909_v8 }
 0x201   : > { %v934_v11 = vmul.f32 %v924_v6, %v914_v10  ;;  %939 = vrot.lane.b32.xlu0 %v1920_v60, %s1853_s30  ;;  %440 = vrot.lane.b32.xlu1 %v1926_v63, %s1851_s23 }
 0x203   : > { %1189 = vmatprep.subr.mxu0 %v934_v11  ;;  %v2020_v13 = vpop.permute.xlu0 %838  ;;  %v905_v14 = vpop.permute.xlu1 %904 }
 0x204   : > { %v915_v15 = vsel %vm912_vm5, %v905_v14, %v907_v9 }
 0x205   : > { %v933_v16 = vmul.f32 %v920_v12, %v915_v15  ;;  %937 = vrot.lane.b32.xlu0 %v1926_v63, %s1853_s30  ;;  %512 = vrot.lane.b32.xlu1 %v1922_v61, %s1849_s19  ;;  %v862_v15 = vrot.slane %v2051_v28, %v2061_v31 }
 0x207   : > { %v878_v18 = vpop.permute.xlu0 %877  ;;  %1190 = vmatpush1.msra.mxu0 %v933_v16  ;;  %v874_v19 = vpop.permute.xlu1 %873 }
 0x209   : > { %943 = vrot.lane.b32.xlu0 %v1930_v0, %s1853_s30  ;;  %479 = vrot.lane.b32.xlu1 %v1922_v61, %s1850_s20 }
 0x20b   : > { %v2038_v21 = vpop.permute.xlu0 %805  ;;  %v876_v22 = vpop.permute.xlu1 %875 }
 0x20c   : > { %v881_v23 = vsel %vm879_vm6, %v874_v19, %v876_v22  ;;  %v880_v44 = vsel %vm879_vm6, %v876_v22, %v878_v18 }
 0x20d   : > { %v901_v24 = vmul.f32 %v891_v20, %v881_v23  ;;  %972 = vrot.lane.b32.xlu1 %v1920_v60, %s1852_s27  ;;  %v902_v50 = vmul.f32 %v895_v36, %v880_v44  ;;  %v2147_v20 = vsub.s32 1, %v1987_v2 }
 0x20f   : > { %v2046_v26 = vpop.permute.xlu0 %811  ;;  %1191 = vmatprep.subr.mxu0 %v901_v24  ;;  %v872_v27 = vpop.permute.xlu1 %871 }
 0x210   : > { %v882_v30 = vsel %vm879_vm6, %v872_v27, %v874_v19  ;;  %v883_v40 = vsel %vm879_vm6, %v878_v18, %v872_v27  ;;  %v866_v19 = vrot.slane %v2056_v29, %v2061_v31  ;;  %vm945_vm6 = vcmp.lt.s32.totalorder %v1992_v3, 120 }
 0x211   : > { %v900_v32 = vmul.f32 %v887_v25, %v882_v30  ;;  %970 = vrot.lane.b32.xlu1 %v1926_v63, %s1852_s27  ;;  %v903_v47 = vmul.f32 %v899_v37, %v883_v40  ;;  %v755_v30 = vrot.slane %v2011_v7, %v2147_v20  ;;  %v829_v37 = vrot.slane %v2051_v28, %v2103_v54 }
 0x213   : > { %v2076_v38 = vpop.permute.xlu0 %774  ;;  %1192 = vmatpush1.msra.mxu0 %v900_v32  ;;  %v911_v39 = vpop.permute.xlu1 %910  ;;  %v759_v32 = vrot.slane %v2000_v5, %v2147_v20 }
 0x214   : > { %v913_v41 = vsel %vm912_vm5, %v909_v8, %v911_v39  ;;  %v916_v42 = vsel %vm912_vm5, %v911_v39, %v905_v14  ;;  %1193 = vmatprep.subr.mxu0 %v1920_v60  ;;  %v2116_v60 = vsub.s32 2, %v1987_v2  ;;  %vm978_vm5 = vcmp.lt.s32.totalorder %v1992_v3, 119 }
 0x215   : > { %v935_v45 = vmul.f32 %v928_v33, %v913_v41  ;;  %v936_v46 = vmul.f32 %v932_v34, %v916_v42  ;;  %941 = vrot.lane.b32.xlu1 %v1922_v61, %s1853_s30  ;;  %1194 = vmatpush1.msra.mxu0 %v1926_v63  ;;  %v817_v63 = vsel %vm813_vm9, %v2046_v26, %v2038_v21  ;;  %v2173_v42 = vsub.s32 0, %v1987_v2 }
 0x216   : > { %v788_v8 = vrot.slane %v2011_v7, %v2116_v60  ;;  %v792_v9 = vrot.slane %v2000_v5, %v2116_v60  ;;  %v834_v10 = vmul.f32 %v821_v62, %v817_v63  ;;  %v833_v41 = vrot.slane %v2056_v29, %v2103_v54  ;;  %v2213_v62 = vld [vmem:[%s2853_s5 + $0x8] sm:$0xff] }
 0x217   : > { %v2093_v48 = vpop.permute.xlu0 %778  ;;  %1260 = vmatprep.subr.mxu1 %v936_v46  ;;  %v841_v49 = vpop.permute.xlu1 %840 }
 0x218   : > { %v849_v51 = vsel %vm846_vm8, %v2020_v13, %v841_v49  ;;  %1261 = vmatpush1.msra.mxu1 %v935_v45 }
 0x219   : > { %v868_v52 = vmul.f32 %v858_v43, %v849_v51  ;;  %976 = vrot.lane.b32.xlu1 %v1930_v0, %s1852_s27  ;;  %1262 = vmatprep.subr.mxu1 %v903_v47  ;;  %v726_v51 = vrot.slane %v2000_v5, %v2173_v42  ;;  %v796_v5 = vrot.slane %v2051_v28, %v2116_v60 }
 0x21a   : > { %1263 = vmatpush1.msra.mxu1 %v902_v50  ;;  %v722_v50 = vrot.slane %v2011_v7, %v2173_v42 }
 0x21b   : > { %v2105_v55 = vpop.permute.xlu0 %741  ;;  %1195 = vmatprep.subr.mxu0 %v868_v52  ;;  %1264 = vmatprep.subr.mxu1 %v1930_v0  ;;  %v845_v56 = vpop.permute.xlu1 %844 }
 0x21c   : > { %v850_v57 = vsel %vm846_vm8, %v845_v56, %v2020_v13  ;;  %1265 = vmatpush1.msra.mxu1 %v1922_v61 }
 0x21d   : > { %v867_v58 = vmul.f32 %v854_v53, %v850_v57 }
 0x21f   : > { %v2124_v0 = vpop.permute.xlu0 %745  ;;  %1196 = vmatpush1.msra.mxu0 %v867_v58  ;;  %v808_v1 = vpop.permute.xlu1 %807  ;;  %v800_v58 = vrot.slane %v2056_v29, %v2116_v60 }
 0x220   : > { %v816_v61 = vsel %vm813_vm9, %v2038_v21, %v808_v1 }
 0x221   : > { %v835_v6 = vmul.f32 %v825_v59, %v816_v61  ;;  %v2208_v59 = vld [vmem:[%s2853_s5] sm:$0xff] }
 0x223   : > { %v2134_v11 = vpop.permute.xlu0 %708  ;;  %1197 = vmatprep.subr.mxu0 %v835_v6  ;;  %v773_v12 = vpop.permute.xlu1 %772 }
 0x224   : > { %v783_v13 = vsel %vm780_vm10, %v773_v12, %v2076_v38  ;;  %v784_v14 = vsel %vm780_vm10, %v2093_v48, %v773_v12  ;;  %1198 = vmatpush1.msra.mxu0 %v834_v10  ;;  %v689_v10 = vrot.slane %v2208_v59, %v1995_v4  ;;  %v693_v12 = vrot.slane %v2213_v62, %v1995_v4 }
 0x225   : > { %v801_v16 = vmul.f32 %v788_v8, %v784_v14  ;;  %v802_v18 = vmul.f32 %v792_v9, %v783_v13 }
 0x227   : > { %v2149_v21 = vpop.permute.xlu0 %712  ;;  %1199 = vmatprep.subr.mxu0 %v802_v18  ;;  %v843_v22 = vpop.permute.xlu1 %842  ;;  %v763_v18 = vrot.slane %v2051_v28, %v2147_v20 }
 0x228   : > { %v847_v23 = vsel %vm846_vm8, %v843_v22, %v845_v56  ;;  %v848_v24 = vsel %vm846_vm8, %v841_v49, %v843_v22  ;;  %1200 = vmatpush1.msra.mxu0 %v801_v16 }
 0x229   : > { %v869_v25 = vmul.f32 %v862_v15, %v848_v24  ;;  %v870_v27 = vmul.f32 %v866_v19, %v847_v23  ;;  %v767_v19 = vrot.slane %v2056_v29, %v2147_v20 }
 0x22b   : > { %v2160_v33 = vpop.permute.xlu0 %675  ;;  %1266 = vmatprep.subr.mxu1 %v870_v27  ;;  %v740_v34 = vpop.permute.xlu1 %739 }
 0x22c   : > { %v750_v35 = vsel %vm747_vm11, %v740_v34, %v2105_v55  ;;  %v751_v36 = vsel %vm747_vm11, %v2124_v0, %v740_v34  ;;  %1267 = vmatpush1.msra.mxu1 %v869_v25  ;;  %v660_v34 = vrot.slane %v2213_v62, %v2029_v17 }
 0x22d   : > { %v768_v39 = vmul.f32 %v755_v30, %v751_v36  ;;  %v769_v40 = vmul.f32 %v759_v32, %v750_v35  ;;  %v656_v32 = vrot.slane %v2208_v59, %v2029_v17 }
 0x22f   : > { %v2175_v43 = vpop.permute.xlu0 %679  ;;  %1201 = vmatprep.subr.mxu0 %v769_v40  ;;  %v810_v44 = vpop.permute.xlu1 %809 }
 0x230   : > { %v814_v45 = vsel %vm813_vm9, %v810_v44, %v2046_v26  ;;  %v815_v46 = vsel %vm813_vm9, %v808_v1, %v810_v44  ;;  %1202 = vmatpush1.msra.mxu0 %v768_v39  ;;  %v2278_v44 = vsub.s32 5, %v1987_v2 }
 0x231   : > { %v836_v47 = vmul.f32 %v829_v37, %v815_v46  ;;  %v837_v49 = vmul.f32 %v833_v41, %v814_v45  ;;  %v730_v37 = vrot.slane %v2051_v28, %v2173_v42  ;;  %v734_v41 = vrot.slane %v2056_v29, %v2173_v42 }
 0x233   : > { %v2187_v52 = vpop.permute.xlu0 %642  ;;  %1268 = vmatprep.subr.mxu1 %v837_v49  ;;  %v707_v53 = vpop.permute.xlu1 %706  ;;  %v623_v49 = vrot.slane %v2208_v59, %v2278_v44 }
 0x234   : > { %v2192_v26 = vsel %vm714_vm12, %v707_v53, %v2134_v11  ;;  %v2197_v56 = vsel %vm714_vm12, %v2149_v21, %v707_v53  ;;  %1269 = vmatpush1.msra.mxu1 %v836_v47 }
 0x235   : > { %v735_v7 = vmul.f32 %v722_v50, %v2197_v56  ;;  %v736_v57 = vmul.f32 %v726_v51, %v2192_v26  ;;  %v627_v50 = vrot.slane %v2213_v62, %v2278_v44 }
 0x237   : > { %v2215_v63 = vpop.permute.xlu0 %646  ;;  %1203 = vmatprep.subr.mxu0 %v736_v57  ;;  %v777_v1 = vpop.permute.xlu1 %776 }
 0x238   : > { %v781_v61 = vsel %vm780_vm10, %v777_v1, %v2093_v48  ;;  %v782_v6 = vsel %vm780_vm10, %v2076_v38, %v777_v1  ;;  %1204 = vmatpush1.msra.mxu0 %v735_v7 }
 0x239   : > { %v803_v8 = vmul.f32 %v796_v5, %v782_v6  ;;  %v804_v9 = vmul.f32 %v800_v58, %v781_v61 }
 0x23b   : > { %v2228_v13 = vpop.permute.xlu0 %609  ;;  %1270 = vmatprep.subr.mxu1 %v804_v9  ;;  %v674_v14 = vpop.permute.xlu1 %673 }
 0x23c   : > { %v2233_v48 = vsel %vm681_vm13, %v674_v14, %v2160_v33  ;;  %v2238_v38 = vsel %vm681_vm13, %v2175_v43, %v674_v14  ;;  %1271 = vmatpush1.msra.mxu1 %v803_v8 }
 0x23d   : > { %v702_v15 = vmul.f32 %v689_v10, %v2238_v38  ;;  %v703_v16 = vmul.f32 %v693_v12, %v2233_v48 }
 0x23f   : > { %v2246_v22 = vpop.permute.xlu0 %613  ;;  %1205 = vmatprep.subr.mxu0 %v703_v16  ;;  %v744_v23 = vpop.permute.xlu1 %743  ;;  %v594_v16 = vrot.slane %v2213_v62, %v2061_v31 }
 0x240   : > { %v748_v24 = vsel %vm747_vm11, %v744_v23, %v2124_v0  ;;  %v749_v25 = vsel %vm747_vm11, %v2105_v55, %v744_v23  ;;  %1206 = vmatpush1.msra.mxu0 %v702_v15  ;;  %v590_v15 = vrot.slane %v2208_v59, %v2061_v31  ;;  %vm1390_vm11 = vcmask 64512  }
 0x241   : > { %v770_v27 = vmul.f32 %v763_v18, %v749_v25  ;;  %v771_v30 = vmul.f32 %v767_v19, %v748_v24 }
 0x243   : > { %v2259_v35 = vpop.permute.xlu0 %576  ;;  %1272 = vmatprep.subr.mxu1 %v771_v30  ;;  %v641_v36 = vpop.permute.xlu1 %640 }
 0x244   : > { %v2264_v0 = vsel %vm648_vm14, %v641_v36, %v2187_v52  ;;  %v2269_v55 = vsel %vm648_vm14, %v2215_v63, %v641_v36  ;;  %1273 = vmatpush1.msra.mxu1 %v770_v27 }
 0x245   : > { %v669_v39 = vmul.f32 %v656_v32, %v2269_v55  ;;  %v670_v40 = vmul.f32 %v660_v34, %v2264_v0 }
 0x247   : > { %v2280_v45 = vpop.permute.xlu0 %580  ;;  %1207 = vmatprep.subr.mxu0 %v670_v40  ;;  %v711_v46 = vpop.permute.xlu1 %710  ;;  %v557_v40 = vrot.slane %v2208_v59, %v2103_v54 }
 0x248   : > { %v2285_v47 = vsel %vm714_vm12, %v711_v46, %v2149_v21  ;;  %v2290_v28 = vsel %vm714_vm12, %v2134_v11, %v711_v46  ;;  %1208 = vmatpush1.msra.mxu0 %v669_v39  ;;  %v2302_v21 = vld [vmem:[%s2853_s5 + $0x10] sm:$0xff]  ;;  %v2307_v11 = vld [vmem:[%s2853_s5 + $0x18] sm:$0xff] }
 0x249   : > { %v737_v2 = vmul.f32 %v730_v37, %v2290_v28  ;;  %v738_v29 = vmul.f32 %v734_v41, %v2285_v47  ;;  %v697_v1 = vrot.slane %v2302_v21, %v1995_v4  ;;  %v701_v61 = vrot.slane %v2307_v11, %v1995_v4 }
 0x24a   : > { %v664_v25 = vrot.slane %v2302_v21, %v2029_v17  ;;  %v668_v27 = vrot.slane %v2307_v11, %v2029_v17  ;;  %v561_v41 = vrot.slane %v2213_v62, %v2103_v54 }
 0x24b   : > { %v2309_v51 = vpop.permute.xlu0 %543  ;;  %1274 = vmatprep.subr.mxu1 %v738_v29  ;;  %v608_v53 = vpop.permute.xlu1 %607 }
 0x24c   : > { %v2314_v7 = vsel %vm615_vm15, %v608_v53, %v2228_v13  ;;  %v2319_v57 = vsel %vm615_vm15, %v2246_v22, %v608_v53  ;;  %1275 = vmatpush1.msra.mxu1 %v737_v2  ;;  %v635_v53 = vrot.slane %v2307_v11, %v2278_v44 }
 0x24d   : > { %v636_v5 = vmul.f32 %v623_v49, %v2319_v57  ;;  %v637_v58 = vmul.f32 %v627_v50, %v2314_v7  ;;  %v631_v50 = vrot.slane %v2302_v21, %v2278_v44 }
 0x24f   : > { %v2327_v6 = vpop.permute.xlu0 %547  ;;  %1209 = vmatprep.subr.mxu0 %v637_v58  ;;  %v678_v8 = vpop.permute.xlu1 %677 }
 0x250   : > { %v2332_v9 = vsel %vm681_vm13, %v678_v8, %v2175_v43  ;;  %v2337_v10 = vsel %vm681_vm13, %v2160_v33, %v678_v8  ;;  %1210 = vmatpush1.msra.mxu0 %v636_v5 }
 0x251   : > { %v704_v12 = vmul.f32 %v697_v1, %v2337_v10  ;;  %v705_v14 = vmul.f32 %v701_v61, %v2332_v9 }
 0x253   : > { %v2346_v43 = vpop.permute.xlu0 %510  ;;  %1276 = vmatprep.subr.mxu1 %v705_v14  ;;  %v575_v18 = vpop.permute.xlu1 %574  ;;  %v528_v14 = vrot.slane %v2213_v62, %v2116_v60 }
 0x254   : > { %v2351_v33 = vsel %vm582_vm0, %v575_v18, %v2259_v35  ;;  %v2356_v19 = vsel %vm582_vm0, %v2280_v45, %v575_v18  ;;  %1277 = vmatpush1.msra.mxu1 %v704_v12  ;;  %v524_v12 = vrot.slane %v2208_v59, %v2116_v60 }
 0x255   : > { %2864 = vst [vmem:[#allocation2_spill] sm:$0xff] %v2356_v19  ;;  %v603_v23 = vmul.f32 %v590_v15, %v2356_v19  ;;  %v604_v24 = vmul.f32 %v594_v16, %v2351_v33 }
 0x257   : > { %v2364_v30 = vpop.permute.xlu0 %514  ;;  %1211 = vmatprep.subr.mxu0 %v604_v24  ;;  %v645_v32 = vpop.permute.xlu1 %644  ;;  %v598_v24 = vrot.slane %v2302_v21, %v2061_v31 }
 0x258   : > { %v2369_v34 = vsel %vm648_vm14, %v645_v32, %v2215_v63  ;;  %v2374_v36 = vsel %vm648_vm14, %v2187_v52, %v645_v32  ;;  %1212 = vmatpush1.msra.mxu0 %v603_v23 }
 0x259   : > { %v671_v37 = vmul.f32 %v664_v25, %v2374_v36  ;;  %v672_v39 = vmul.f32 %v668_v27, %v2369_v34  ;;  %v602_v25 = vrot.slane %v2307_v11, %v2061_v31 }
 0x25b   : > { %1278 = vmatprep.subr.mxu1 %v672_v39  ;;  %v542_v63 = vpop.permute.xlu1 %541  ;;  %v2383_v46 = vpop.permute.xlu0 %477 }
 0x25c   : > { %v2388_v52 = vsel %vm549_vm1, %v542_v63, %v2309_v51  ;;  %v2393_v2 = vsel %vm549_vm1, %v2327_v6, %v542_v63  ;;  %1279 = vmatpush1.msra.mxu1 %v671_v37  ;;  %v491_v63 = vrot.slane %v2208_v59, %v2147_v20 }
 0x25d   : > { %2865 = vst [vmem:[#allocation3_spill] sm:$0xff] %v2393_v2  ;;  %v570_v29 = vmul.f32 %v557_v40, %v2393_v2  ;;  %v571_v49 = vmul.f32 %v561_v41, %v2388_v52 }
 0x25f   : > { %1213 = vmatprep.subr.mxu0 %v571_v49  ;;  %v612_v5 = vpop.permute.xlu1 %611  ;;  %v2463_v49 = vld [vmem:[%s2853_s5 + $0x78] sm:$0xff] }
 0x260   : > { %v2404_v58 = vsel %vm615_vm15, %v612_v5, %v2246_v22  ;;  %v2409_v1 = vsel %vm615_vm15, %v2228_v13, %v612_v5  ;;  %1214 = vmatpush1.msra.mxu0 %v570_v29  ;;  %v2418_v22 = vpop.permute.xlu0 %481  ;;  %v495_v29 = vrot.slane %v2213_v62, %v2147_v20  ;;  %v2478_v5 = vld [vmem:[%s2853_s5 + $0x68] sm:$0xff] }
 0x261   : > { %2866 = vst [vmem:[#allocation4_spill] sm:$0xff] %v2404_v58  ;;  %v638_v61 = vmul.f32 %v631_v50, %v2409_v1  ;;  %v639_v8 = vmul.f32 %v635_v53, %v2404_v58 }
 0x263   : > { %1280 = vmatprep.subr.mxu1 %v639_v8  ;;  %v509_v15 = vpop.permute.xlu1 %508  ;;  %v569_v8 = vrot.slane %v2307_v11, %v2103_v54 }
 0x264   : > { %v2423_v13 = vsel %vm516_vm2, %v509_v15, %v2346_v43  ;;  %v2428_v16 = vsel %vm516_vm2, %v2364_v30, %v509_v15  ;;  %1281 = vmatpush1.msra.mxu1 %v638_v61  ;;  %v2436_v32 = vpop.permute.xlu0 %442  ;;  %v565_v61 = vrot.slane %v2302_v21, %v2103_v54 }
 0x265   : > { %2867 = vst [vmem:[#allocation5_spill] sm:$0xff] %v2428_v16  ;;  %v537_v18 = vmul.f32 %v524_v12, %v2428_v16  ;;  %v538_v23 = vmul.f32 %v528_v14, %v2423_v13 }
 0x267   : > { %1215 = vmatprep.subr.mxu0 %v538_v23  ;;  %v579_v27 = vpop.permute.xlu1 %578 }
 0x268   : > { %v2441_v37 = vsel %vm582_vm0, %v579_v27, %v2280_v45  ;;  %v2446_v39 = vsel %vm582_vm0, %v2259_v35, %v579_v27  ;;  %1216 = vmatpush1.msra.mxu0 %v537_v18  ;;  %v2458_v45 = vld [vmem:[%s2853_s5 + $0x60] sm:$0xff]  ;;  %v2486_v14 = vpop.permute.xlu0 %446 }
 0x269   : > { %2868 = vst [vmem:[#allocation6_spill] sm:$0xff] %v2441_v37  ;;  %v605_v40 = vmul.f32 %v598_v24, %v2446_v39  ;;  %v606_v41 = vmul.f32 %v602_v25, %v2441_v37  ;;  %v1166_v12 = vrot.slane %v2458_v45, %v2116_v60  ;;  %v1146_v24 = vrot.slane %v2458_v45, %v2147_v20 }
 0x26a   : > { %v1170_v25 = vrot.slane %v2478_v5, %v2116_v60 }
 0x26b   : > { %1282 = vmatprep.subr.mxu1 %v606_v41  ;;  %v476_v35 = vpop.permute.xlu1 %475  ;;  %v2506_v41 = vld [vmem:[%s2853_s5 + $0x40] sm:$0xff]  ;;  %v1179_v19 = vmul.f32 %v1166_v12, %v2192_v26  ;;  %v503_v26 = vrot.slane %v2307_v11, %v2147_v20 }
 0x26c   : > { %v2468_v50 = vsel %vm483_vm3, %v476_v35, %v2383_v46  ;;  %v2473_v53 = vsel %vm483_vm3, %v2418_v22, %v476_v35  ;;  %1283 = vmatpush1.msra.mxu1 %v605_v40  ;;  %v2501_v40 = vld [vmem:[%s2853_s5 + $0x70] sm:$0xff]  ;;  %v458_v35 = vrot.slane %v2208_v59, %v2173_v42 }
 0x26d   : > { %2869 = vst [vmem:[#allocation7_spill] sm:$0xff] %v2473_v53  ;;  %v504_v15 = vmul.f32 %v491_v63, %v2473_v53  ;;  %v505_v18 = vmul.f32 %v495_v29, %v2468_v50  ;;  %v2511_v63 = vld [vmem:[%s2853_s5 + $0x58] sm:$0xff] }
 0x26f   : > { %v546_v29 = vpop.permute.xlu1 %545  ;;  %1217 = vmatprep.subr.mxu0 %v505_v18  ;;  %v462_v18 = vrot.slane %v2213_v62, %v2173_v42  ;;  %v536_v62 = vrot.slane %v2307_v11, %v2116_v60 }
 0x270   : > { %v2520_v23 = vsel %vm549_vm1, %v546_v29, %v2327_v6  ;;  %v2525_v27 = vsel %vm549_vm1, %v2309_v51, %v546_v29  ;;  %1218 = vmatpush1.msra.mxu0 %v504_v15  ;;  %v2550_v15 = vld [vmem:[%s2853_s5 + $0x48] sm:$0xff]  ;;  %v2555_v29 = vld [vmem:[%s2853_s5 + $0x50] sm:$0xff]  ;;  %v445_v6 = vpop.permute.xlu0 %444 }
 0x271   : > { %2870 = vst [vmem:[#allocation8_spill] sm:$0xff] %v2520_v23  ;;  %v572_v53 = vmul.f32 %v565_v61, %v2525_v27  ;;  %v573_v16 = vmul.f32 %v569_v8, %v2520_v23  ;;  %v1150_v61 = vrot.slane %v2478_v5, %v2147_v20  ;;  %v1130_v8 = vrot.slane %v2478_v5, %v2173_v42 }
 0x272   : > { %v532_v5 = vrot.slane %v2302_v21, %v2116_v60  ;;  %v1090_v37 = vrot.slane %v2550_v15, %v2029_v17  ;;  %v1094_v12 = vrot.slane %v2555_v29, %v2029_v17 }
 0x273   : > { %1284 = vmatprep.subr.mxu1 %v573_v16  ;;  %v441_v51 = vpop.permute.xlu1 %440 }
 0x274   : > { %v2565_v59 = vsel %vm450_vm4, %v441_v51, %v2436_v32  ;;  %v2570_v2 = vsel %vm450_vm4, %v2486_v14, %v441_v51  ;;  %1285 = vmatpush1.msra.mxu1 %v572_v53  ;;  %v1110_v51 = vrot.slane %v2550_v15, %v1995_v4 }
 0x275   : > { %2871 = vst [vmem:[#allocation9_spill] sm:$0xff] %v2565_v59  ;;  %2872 = vst [vmem:[#allocation10_spill] sm:$0xff] %v2570_v2  ;;  %v471_v16 = vmul.f32 %v458_v35, %v2570_v2  ;;  %v472_v23 = vmul.f32 %v462_v18, %v2565_v59  ;;  %v1180_v35 = vmul.f32 %v1170_v25, %v2290_v28 }
 0x276   : > { %v1046_v18 = vrot.slane %v2506_v41, %v2061_v31  ;;  %v499_v25 = vrot.slane %v2302_v21, %v2147_v20  ;;  %v1160_v2 = vmul.f32 %v1150_v61, %v2337_v10  ;;  %v2873_v10 = vrot.slane %v2458_v45, %v2173_v42 }
 0x277   : > { %1219 = vmatprep.subr.mxu0 %v472_v23  ;;  %v513_v59 = vpop.permute.xlu1 %512 }
 0x278   : > { %v2597_v58 = vsel %vm516_vm2, %v513_v59, %v2364_v30  ;;  %v518_v28 = vsel %vm516_vm2, %v2346_v43, %v513_v59  ;;  %1220 = vmatpush1.msra.mxu0 %v471_v16  ;;  %v1159_v30 = vmul.f32 %v1146_v24, %v2233_v48  ;;  %v466_v43 = vrot.slane %v2302_v21, %v2173_v42  ;;  %v2615_v16 = vpop.permute.xlu0 %974 }
 0x279   : > { %v539_v53 = vmul.f32 %v532_v5, %v518_v28  ;;  %v540_v23 = vmul.f32 %v536_v62, %v2597_v58  ;;  %1231 = vmatprep.subr.mxu0 %v1180_v35  ;;  %v470_v59 = vrot.slane %v2307_v11, %v2173_v42  ;;  %v1139_v61 = vmul.f32 %v2873_v10, %v2264_v0 }
 0x27a   : > { %1232 = vmatpush2.msra.mxu0 %v1179_v19  ;;  %v1140_v62 = vmul.f32 %v1130_v8, %v2374_v36  ;;  %v1070_v48 = vrot.slane %v2550_v15, %v2278_v44  ;;  %v2627_v21 = vsel %vm450_vm4, %v445_v6, %v2486_v14  ;;  %v1120_v19 = vmul.f32 %v1110_v51, %v2409_v1 }
 0x27b   : > { %1233 = vmatprep.subr.mxu0 %v1160_v2  ;;  %1286 = vmatprep.subr.mxu1 %v540_v23  ;;  %v480_v24 = vpop.permute.xlu1 %479  ;;  %v452_v36 = vsel %vm450_vm4, %v2436_v32, %v445_v6  ;;  %v1026_v8 = vrot.slane %v2506_v41, %v2103_v54  ;;  %v1074_v1 = vrot.slane %v2555_v29, %v2278_v44 }
 0x27c   : > { %v2632_v11 = vsel %vm483_vm3, %v480_v24, %v2418_v22  ;;  %v485_v0 = vsel %vm483_vm3, %v2383_v46, %v480_v24  ;;  %1234 = vmatpush2.msra.mxu0 %v1159_v30  ;;  %1287 = vmatpush1.msra.mxu1 %v539_v53  ;;  %v2874_v22 = vrot.slane %v2506_v41, %v1995_v4 }
 0x27d   : > { %v506_v2 = vmul.f32 %v499_v25, %v485_v0  ;;  %v507_v45 = vmul.f32 %v503_v26, %v2632_v11  ;;  %1235 = vmatprep.subr.mxu0 %v1140_v62  ;;  %v1010_v46 = vrot.slane %v2550_v15, %v2116_v60  ;;  %v1100_v32 = vmul.f32 %v1090_v37, %v2446_v39  ;;  %v940_v25 = vpop.permute.xlu0 %939 }
 0x27e   : > { %v1119_v14 = vmul.f32 %v2874_v22, %v2314_v7  ;;  %1236 = vmatpush2.msra.mxu0 %v1139_v61  ;;  %v474_v6 = vmul.f32 %v470_v59, %v2627_v21  ;;  %v1050_v5 = vrot.slane %v2550_v15, %v2061_v31  ;;  %v2875_v51 = vrot.slane %v2506_v41, %v2029_v17 }
 0x27f   : > { %1237 = vmatprep.subr.mxu0 %v1120_v19  ;;  %1288 = vmatprep.subr.mxu1 %v507_v45  ;;  %v973_v7 = vpop.permute.xlu1 %972  ;;  %v473_v35 = vmul.f32 %v466_v43, %v452_v36  ;;  %v1006_v23 = vrot.slane %v2506_v41, %v2116_v60  ;;  %v2876_v37 = vrot.slane %v2463_v49, %v2116_v60 }
 0x280   : > { %v1099_v53 = vmul.f32 %v2875_v51, %v2351_v33  ;;  %1238 = vmatpush2.msra.mxu0 %v1119_v14  ;;  %1289 = vmatpush1.msra.mxu1 %v506_v2  ;;  %v1080_v26 = vmul.f32 %v1070_v48, %v2525_v27  ;;  %v1030_v30 = vrot.slane %v2550_v15, %v2103_v54 }
 0x281   : > { %v1182_v39 = vmul.f32 %v2876_v37, %v2197_v56  ;;  %1239 = vmatprep.subr.mxu0 %v1100_v32  ;;  %1290 = vmatprep.subr.mxu1 %v474_v6  ;;  %v2877_v33 = vrot.slane %v2501_v40, %v2116_v60  ;;  %v2878_v59 = vrot.slane %v2506_v41, %v2278_v44  ;;  %v938_v22 = vpop.permute.xlu0 %937  ;;  %v2886_v32 = vld [vmem:[#allocation9_spill] sm:$0xff]  ;;  %v2890_v37 = vld [vmem:[#allocation3_spill] sm:$0xff] }
 0x282   : > { %v953_v56 = vrot.slane %v2506_v41, %v2173_v42  ;;  %1240 = vmatpush2.msra.mxu0 %v1099_v53  ;;  %1291 = vmatpush1.msra.mxu1 %v473_v35  ;;  %v2879_v27 = vrot.slane %v2463_v49, %v2147_v20  ;;  %v1060_v62 = vmul.f32 %v1050_v5, %v518_v28 }
 0x283   : > { %v1181_v43 = vmul.f32 %v2877_v33, %v2285_v47  ;;  %v1079_v10 = vmul.f32 %v2878_v59, %v2388_v52  ;;  %v990_v47 = vrot.slane %v2550_v15, %v2147_v20  ;;  %1241 = vmatprep.subr.mxu0 %v1080_v26  ;;  %1302 = vmatprep.subr.mxu1 %v1182_v39  ;;  %v2686_v48 = vpop.permute.xlu1 %970  ;;  %v2892_v33 = vld [vmem:[#allocation8_spill] sm:$0xff]  ;;  %v1183_v59 = vld [vmem:[%s2850_s2] sm:$0xff] }
 0x284   : > { %v1162_v61 = vmul.f32 %v2879_v27, %v2238_v38  ;;  %v2880_v52 = vrot.slane %v2501_v40, %v2147_v20  ;;  %v1059_v38 = vmul.f32 %v1046_v18, %v2423_v13  ;;  %v986_v28 = vrot.slane %v2506_v41, %v2147_v20 }
 0x285   : > { %1242 = vmatpush2.msra.mxu0 %v1079_v10  ;;  %1303 = vmatpush2.msra.mxu1 %v1181_v43  ;;  %v2881_v19 = vrot.slane %v2463_v49, %v2173_v42  ;;  %v1040_v45 = vmul.f32 %v1030_v30, %v485_v0  ;;  %v2882_v13 = vrot.slane %v2501_v40, %v2173_v42  ;;  %v2884_v40 = vld [vmem:[#allocation4_spill] sm:$0xff]  ;;  %v2893_v10 = vld [vmem:[#allocation5_spill] sm:$0xff] }
 0x286   : > { %v1161_v24 = vmul.f32 %v2880_v52, %v2332_v9  ;;  %1243 = vmatprep.subr.mxu0 %v1060_v62  ;;  %1304 = vmatprep.subr.mxu1 %v1162_v61  ;;  %v957_v9 = vrot.slane %v2550_v15, %v2173_v42  ;;  %v1039_v41 = vmul.f32 %v1026_v8, %v2468_v50  ;;  %v944_v52 = vpop.permute.xlu0 %943 }
 0x287   : > { %v1142_v2 = vmul.f32 %v2881_v19, %v2269_v55  ;;  %v1141_v18 = vmul.f32 %v2882_v13, %v2369_v34  ;;  %v980_v55 = vsel %vm978_vm5, %v973_v7, %v2615_v16  ;;  %1244 = vmatpush2.msra.mxu0 %v1059_v38  ;;  %v2883_v49 = vrot.slane %v2511_v63, %v1995_v4  ;;  %v942_v50 = vpop.permute.xlu1 %941 }
 0x288   : > { %1305 = vmatpush2.msra.mxu1 %v1161_v24  ;;  %v1020_v0 = vmul.f32 %v1010_v46, %v452_v36  ;;  %v981_v34 = vsel %vm978_vm5, %v2686_v48, %v973_v7  ;;  %1245 = vmatprep.subr.mxu0 %v1040_v45  ;;  %v2885_v14 = vrot.slane %v2555_v29, %v1995_v4  ;;  %v2889_v4 = vld [vmem:[#allocation6_spill] sm:$0xff] }
 0x289   : > { %v1122_v15 = vmul.f32 %v2883_v49, %v2319_v57  ;;  %1306 = vmatprep.subr.mxu1 %v1142_v2  ;;  %v1019_v6 = vmul.f32 %v1006_v23, %v2886_v32  ;;  %v947_v5 = vsel %vm945_vm6, %v940_v25, %v942_v50  ;;  %1246 = vmatpush2.msra.mxu0 %v1039_v41  ;;  %v2887_v57 = vld [vmem:[#allocation2_spill] sm:$0xff] }
 0x28a   : > { %v1121_v8 = vmul.f32 %v2885_v14, %v2884_v40  ;;  %1307 = vmatpush2.msra.mxu1 %v1141_v18  ;;  %v2888_v36 = vrot.slane %v2511_v63, %v2029_v17  ;;  %v948_v7 = vsel %vm945_vm6, %v938_v22, %v940_v25  ;;  %v1000_v51 = vmul.f32 %v990_v47, %v980_v55  ;;  %v2788_v32 = vld [vmem:[%s2852_s4] sm:$0xff] }
 0x28b   : > { %1247 = vmatprep.subr.mxu0 %v1020_v0  ;;  %1308 = vmatprep.subr.mxu1 %v1122_v15  ;;  %v1101_v53 = vmul.f32 %v1094_v12, %v2889_v4  ;;  %v1054_v35 = vrot.slane %v2555_v29, %v2061_v31  ;;  %v999_v23 = vmul.f32 %v986_v28, %v981_v34  ;;  %v1855_v18 = vmov 3  }
 0x28c   : > { %v1102_v46 = vmul.f32 %v2888_v36, %v2887_v57  ;;  %1248 = vmatpush2.msra.mxu0 %v1019_v6  ;;  %1309 = vmatpush2.msra.mxu1 %v1121_v8  ;;  %v2891_v39 = vrot.slane %v2511_v63, %v2278_v44  ;;  %v1038_v25 = vrot.slane %v2511_v63, %v2103_v54  ;;  %v977_v44 = vpop.permute.xlu1 %976  ;;  %v1856_v6 = vmov 0.0  }
 0x28d   : > { %v967_v30 = vmul.f32 %v957_v9, %v947_v5  ;;  %1249 = vmatprep.subr.mxu0 %v1000_v51  ;;  %v1081_v17 = vmul.f32 %v1074_v1, %v2892_v33  ;;  %v966_v12 = vmul.f32 %v953_v56, %v948_v7  ;;  %v1034_v43 = vrot.slane %v2555_v29, %v2103_v54  ;;  %v2895_v56 = vld [vmem:[#allocation7_spill] sm:$0xff] }
 0x28e   : > { %v1082_v26 = vmul.f32 %v2891_v39, %v2890_v37  ;;  %1310 = vmatprep.subr.mxu1 %v1102_v46  ;;  %1250 = vmatpush2.msra.mxu0 %v999_v23  ;;  %v2894_v27 = vrot.slane %v2511_v63, %v2061_v31  ;;  %v1018_v62 = vrot.slane %v2511_v63, %v2116_v60 }
 0x28f   : > { %1311 = vmatpush2.msra.mxu1 %v1101_v53  ;;  %1251 = vmatprep.subr.mxu0 %v967_v30  ;;  %v1014_v54 = vrot.slane %v2555_v29, %v2116_v60  ;;  %v1061_v1 = vmul.f32 %v1054_v35, %v2597_v58  ;;  %v1042_v47 = vmul.f32 %v1038_v25, %v2895_v56  ;;  %v2896_v58 = vld [vmem:[#allocation10_spill] sm:$0xff] }
 0x290   : > { %v1062_v61 = vmul.f32 %v2894_v27, %v2893_v10  ;;  %1312 = vmatprep.subr.mxu1 %v1082_v26  ;;  %1252 = vmatpush2.msra.mxu0 %v966_v12  ;;  %v998_v31 = vrot.slane %v2511_v63, %v2147_v20  ;;  %v1041_v24 = vmul.f32 %v1034_v43, %v2632_v11 }
 0x291   : > { %1313 = vmatpush2.msra.mxu1 %v1081_v17  ;;  %1254 = vmatmul.mubr.f32.vlgmr.msra.gmra.mxu0 %v1183_v59  ;;  %v994_v38 = vrot.slane %v2555_v29, %v2147_v20  ;;  %v982_v60 = vsel %vm978_vm5, %v977_v44, %v2686_v48  ;;  %v1022_v28 = vmul.f32 %v1018_v62, %v2896_v58 }
 0x292   : > { %1314 = vmatprep.subr.mxu1 %v1062_v61  ;;  %v965_v19 = vrot.slane %v2511_v63, %v2173_v42  ;;  %v979_v2 = vsel %vm978_vm5, %v2615_v16, %v977_v44  ;;  %v1021_v11 = vmul.f32 %v1014_v54, %v2627_v21  ;;  %v949_v20 = vsel %vm945_vm6, %v944_v52, %v938_v22 }
 0x293   : > { %1315 = vmatpush2.msra.mxu1 %v1061_v1  ;;  %v961_v45 = vrot.slane %v2555_v29, %v2173_v42  ;;  %v946_v48 = vsel %vm945_vm6, %v942_v50, %v944_v52  ;;  %v1002_v9 = vmul.f32 %v998_v31, %v982_v60  ;;  %v1001_v63 = vmul.f32 %v994_v38, %v979_v2  ;;  %v1388_v60 = vld [vmem:[%s2851_s3] sm:$0xff] }
 0x294   : > { %1316 = vmatprep.subr.mxu1 %v1042_v47  ;;  %v969_v13 = vmul.f32 %v965_v19, %v949_v20  ;;  %v1854_v21 = vmov 2   ;;  %1805 = vset.pattern.permute.xlu1 %v1855_v18  ;;  %v1389_v19 = vld [vmem:[%s2851_s3 + $0x8] sm:$0xff]  ;;  %v1857_v2 = vmov 4  }
 0x295   : > { %1317 = vmatpush2.msra.mxu1 %v1041_v24  ;;  %v968_v16 = vmul.f32 %v961_v45, %v946_v48  ;;  %1804 = vset.pattern.permute.xlu0 %v1854_v21 }
 0x296   : > { %1318 = vmatprep.subr.mxu1 %v1022_v28  ;;  %1461 = vmatprep.mubr.f32.mxu0 %v1856_v6 }
 0x297   : > { %1319 = vmatpush2.msra.mxu1 %v1021_v11 }
 0x298   : > { %1320 = vmatprep.subr.mxu1 %v1002_v9 }
 0x299   : > { %1321 = vmatpush2.msra.mxu1 %v1001_v63 }
 0x29a   : > { %1322 = vmatprep.subr.mxu1 %v969_v13 }
 0x29b   : > { %1323 = vmatpush2.msra.mxu1 %v968_v16 }
 0x29c   : > { %1325 = vmatmul.mubr.f32.vlgmr.msra.gmra.mxu1 %v1183_v59 }
 0x29d   : > { %1538 = vmatprep.mubr.f32.mxu1 %v1856_v6 }
 0x351   : > { %v1255_v42 = vpop.f32.mrf.mxu0 }
 0x352   : > { %v1337_v41 = vmul.f32 %v1255_v42, %v1255_v42 }
 0x353   : > { %v1257_v29 = vpop.f32.mrf.mxu0 }
 0x354   : > { %v1338_v3 = vmul.f32 %v1257_v29, %v1257_v29  ;;  %v1331_v22 = vadd.f32 %v1257_v29, %v1255_v42 }
 0x356   : > { %v1341_v0 = vadd.f32 %v1338_v3, %v1337_v41 }
 0x35c   : > { %v1326_v55 = vpop.f32.mrf.mxu1 }
 0x35d   : > { %v1339_v49 = vmul.f32 %v1326_v55, %v1326_v55  ;;  %v1332_v15 = vadd.f32 %v1331_v22, %v1326_v55 }
 0x35e   : > { %v1328_v34 = vpop.f32.mrf.mxu1 }
 0x35f   : > { %v1333_v50 = vadd.f32 %v1332_v15, %v1328_v34  ;;  %v1340_v40 = vmul.f32 %v1328_v34, %v1328_v34  ;;  %v1342_v14 = vadd.f32 %v1341_v0, %v1339_v49 }
 0x361   : > { %1334 = vadd.xlane.f32.xlu1 %v1333_v50  ;;  %v1343_v8 = vadd.f32 %v1342_v14, %v1340_v40  ;;  %v1858_v40 = vmov 5   ;;  %v254_v14 = vld [vmem:[%s2852_s4 + $0x8] sm:$0xff] }
 0x363   : > { %1344 = vadd.xlane.f32.xlu0 %v1343_v8 }
 0x372   : > { %1369 = vperm.xlu1 %1805, %v2788_v32  }
 0x376   : > { %1806 = vset.pattern.permute.xlu1 %v1857_v2 }
 0x379   : > { %1361 = vperm.xlu0 %1804, %v2788_v32  }
 0x37d   : > { %1807 = vset.pattern.permute.xlu0 %v1857_v2 }
 0x3ea   : > { %v1335_v5 = vpop.xlane.xlu1 %1334 }
 0x3eb   : > { %v1336_v57 = vmul.f32 0.001953125, %v1335_v5 }
 0x3ec   : > { %v1345_v36 = vpop.xlane.xlu0 %1344 }
 0x3ed   : > { %v1346_v46 = vmul.f32 0.001953125, %v1345_v36  ;;  %v1347_v7 = vmul.f32 %v1336_v57, %v1336_v57  ;;  %v1350_v35 = vsub.f32 %v1255_v42, %v1336_v57  ;;  %v1351_v23 = vsub.f32 %v1257_v29, %v1336_v57 }
 0x3ee   : > { %v1352_v37 = vsub.f32 %v1326_v55, %v1336_v57  ;;  %v1353_v39 = vsub.f32 %v1328_v34, %v1336_v57  ;;  %v1370_v43 = vpop.permute.xlu1 %1369 }
 0x3ef   : > { %v1348_v51 = vsub.f32 %v1346_v46, %v1347_v7 }
 0x3f1   : > { %v1349_v4 = vmax.f32 %v1348_v51, 0.0 }
 0x3f3   : > { %v1354_v53 = vadd.f32 1e-05, %v1349_v4 }
 0x3f4   : > { %v1362_v25 = vpop.permute.xlu0 %1361 }
 0x3f5   : > { %1816 = vrsqrt.f32 %v1354_v53 }
 0x402   : > { %v1817_v26 = vpop.eup %1816 }
 0x403   : > { %v1356_v30 = vmul.f32 %v1817_v26, %v1350_v35  ;;  %v1357_v33 = vmul.f32 %v1817_v26, %v1351_v23  ;;  %v1358_v17 = vmul.f32 %v1817_v26, %v1352_v37  ;;  %v1359_v12 = vmul.f32 %v1817_v26, %v1353_v39 }
 0x405   : > { %v1364_v59 = vmul.f32 %v1362_v25, %v1356_v30  ;;  %v1365_v10 = vmul.f32 %v1362_v25, %v1357_v33  ;;  %v1366_v27 = vmul.f32 %v1362_v25, %v1358_v17  ;;  %v1367_v61 = vmul.f32 %v1362_v25, %v1359_v12 }
 0x407   : > { %v1372_v62 = vadd.f32 %v1370_v43, %v1364_v59  ;;  %v1373_v44 = vadd.f32 %v1370_v43, %v1365_v10  ;;  %v1374_v54 = vadd.f32 %v1370_v43, %v1366_v27  ;;  %v1375_v1 = vadd.f32 %v1370_v43, %v1367_v61  ;;  %v1823_v61 = vld [vmem:[%s1908_s26] sm:$0xff] }
 0x409   : > { %vm1377_vm7 = vcmp.ge.f32.partialorder %v1373_v44, 0.0  ;;  %v1381_v56 = vmul.f32 0.01, %v1373_v44  ;;  %vm1379_vm8 = vcmp.ge.f32.partialorder %v1375_v1, 0.0  ;;  %v1383_v47 = vmul.f32 0.01, %v1375_v1 }
 0x40a   : > { %vm1376_vm9 = vcmp.ge.f32.partialorder %v1372_v62, 0.0  ;;  %v1380_v52 = vmul.f32 0.01, %v1372_v62  ;;  %vm1378_vm10 = vcmp.ge.f32.partialorder %v1374_v54, 0.0  ;;  %v1382_v31 = vmul.f32 0.01, %v1374_v54 }
 0x40b   : > { %v1385_v24 = vsel %vm1377_vm7, %v1373_v44, %v1381_v56  ;;  %v1387_v38 = vsel %vm1379_vm8, %v1375_v1, %v1383_v47  ;;  %v1643_v44 = vunpack.c.h.bf16 %v1823_v61 }
 0x40c   : > { %1427 = vmatprep.subr.mxu0 %v1385_v24  ;;  %1504 = vmatprep.subr.mxu1 %v1387_v38  ;;  %v1384_v58 = vsel %vm1376_vm9, %v1372_v62, %v1380_v52  ;;  %v1386_v28 = vsel %vm1378_vm10, %v1374_v54, %v1382_v31  ;;  %v1642_v62 = vunpack.c.l.bf16 %v1823_v61  ;;  %v1824_v54 = vld [vmem:[%s1908_s26 + $0x8] sm:$0xff] }
 0x40d   : > { %1428 = vmatpush1.msra.mxu0 %v1384_v58  ;;  %1505 = vmatpush1.msra.mxu1 %v1386_v28  ;;  %v1644_v1 = vunpack.c.l.bf16 %v1824_v54  ;;  %v1645_v56 = vunpack.c.h.bf16 %v1824_v54 }
 0x40e   : > { %1762 = vmatmul.mubr.msk.f32.vlgmr.msra.gmra.mxu0 %vm1390_vm11, %v1388_v60  ;;  %1764 = vmatmul.mubr.msk.f32.vlgmr.msra.gmra.mxu1 %vm1390_vm11, %v1388_v60 }
 0x40f   : > { %1467 = vmatprep.mubr.f32.mxu0 %v1856_v6  ;;  %1544 = vmatprep.mubr.f32.mxu1 %v1856_v6 }
 0x412   : > { %1763 = vmatmul.mubr.msk.f32.gmra.mxu0 %vm1390_vm11, %v1389_v19  ;;  %1765 = vmatmul.mubr.msk.f32.gmra.mxu1 %vm1390_vm11, %v1389_v19 }
 0x4ce   : > { %v1463_v11 = vpop.f32.mrf.mxu0  ;;  %v1540_v20 = vpop.f32.mrf.mxu1 }
 0x4cf   : > { %v1563_v9 = vmul.f32 %v1463_v11, %v1463_v11  ;;  %v1565_v21 = vmul.f32 %v1540_v20, %v1540_v20 }
 0x4d0   : > { %v1465_v45 = vpop.f32.mrf.mxu0  ;;  %v1542_v48 = vpop.f32.mrf.mxu1 }
 0x4d1   : > { %v1551_v63 = vadd.f32 %v1465_v45, %v1463_v11  ;;  %v1564_v13 = vmul.f32 %v1465_v45, %v1465_v45  ;;  %v1566_v15 = vmul.f32 %v1542_v48, %v1542_v48 }
 0x4d2   : > { %v2798_v16 = vpop.f32.mrf.mxu0  ;;  %v2800_v18 = vpop.f32.mrf.mxu1 }
 0x4d3   : > { %v1552_v42 = vadd.f32 %v1551_v63, %v1540_v20  ;;  %v1571_v29 = vadd.f32 %v1564_v13, %v1563_v9  ;;  %v1567_v8 = vmul.f32 %v2798_v16, %v2798_v16  ;;  %v1569_v57 = vmul.f32 %v2800_v18, %v2800_v18 }
 0x4d4   : > { %v2802_v41 = vpop.f32.mrf.mxu0  ;;  %v2806_v55 = vpop.f32.mrf.mxu1 }
 0x4d5   : > { %v1556_v3 = vadd.f32 %v2802_v41, %v2798_v16  ;;  %v1553_v22 = vadd.f32 %v1552_v42, %v1542_v48  ;;  %v1572_v49 = vadd.f32 %v1571_v29, %v1565_v21  ;;  %v1568_v6 = vmul.f32 %v2802_v41, %v2802_v41 }
 0x4d6   : > { %v1570_v36 = vmul.f32 %v2806_v55, %v2806_v55 }
 0x4d7   : > { %1554 = vadd.xlane.f32.xlu1 %v1553_v22  ;;  %v1557_v0 = vadd.f32 %v1556_v3, %v2800_v18  ;;  %v1573_v34 = vadd.f32 %v1572_v49, %v1566_v15  ;;  %v1576_v5 = vadd.f32 %v1568_v6, %v1567_v8 }
 0x4d9   : > { %v1558_v50 = vadd.f32 %v1557_v0, %v2806_v55  ;;  %v1577_v46 = vadd.f32 %v1576_v5, %v1569_v57 }
 0x4db   : > { %1574 = vadd.xlane.f32.xlu1 %v1573_v34  ;;  %1559 = vadd.xlane.f32.xlu0 %v1558_v50  ;;  %v1578_v7 = vadd.f32 %v1577_v46, %v1570_v36 }
 0x4ec   : > { %1610 = vperm.xlu1 %1806, %v2788_v32  }
 0x4f0   : > { %1808 = vset.pattern.permute.xlu1 %v1858_v40 }
 0x4f1   : > { %1627 = vperm.xlu1 %1808, %v2788_v32   ;;  %1615 = vperm.xlu0 %1807, %v254_v14  }
 0x4f5   : > { %1809 = vset.pattern.permute.xlu0 %v1858_v40 }
 0x515   : > { %1579 = vadd.xlane.f32.xlu1 %v1578_v7 }
 0x526   : > { %1631 = vperm.xlu1 %1808, %v254_v14  }
 0x560   : > { %v1555_v32 = vpop.xlane.xlu1 %1554 }
 0x561   : > { %v1561_v51 = vmul.f32 0.001953125, %v1555_v32 }
 0x563   : > { %v1583_v53 = vmul.f32 %v1561_v51, %v1561_v51  ;;  %v1589_v25 = vsub.f32 %v1463_v11, %v1561_v51  ;;  %v1590_v30 = vsub.f32 %v1465_v45, %v1561_v51  ;;  %v1591_v33 = vsub.f32 %v1540_v20, %v1561_v51 }
 0x564   : > { %v1575_v4 = vpop.xlane.xlu1 %1574  ;;  %v1592_v17 = vsub.f32 %v1542_v48, %v1561_v51  ;;  %v1560_v22 = vpop.xlane.xlu0 %1559 }
 0x565   : > { %v1581_v35 = vmul.f32 0.001953125, %v1575_v4  ;;  %v1562_v49 = vmul.f32 0.001953125, %v1560_v22 }
 0x567   : > { %v1585_v23 = vsub.f32 %v1581_v35, %v1583_v53  ;;  %v1584_v34 = vmul.f32 %v1562_v49, %v1562_v49  ;;  %v1593_v8 = vsub.f32 %v2798_v16, %v1562_v49  ;;  %v1594_v6 = vsub.f32 %v2802_v41, %v1562_v49  ;;  %v1825_v53 = vld [vmem:[%s1908_s26 + $0x10] sm:$0xff] }
 0x568   : > { %v1611_v26 = vpop.permute.xlu1 %1610  ;;  %v1595_v5 = vsub.f32 %v2800_v18, %v1562_v49  ;;  %v1596_v57 = vsub.f32 %v2806_v55, %v1562_v49  ;;  %v1646_v35 = vunpack.c.l.bf16 %v1825_v53 }
 0x569   : > { %v1587_v37 = vmax.f32 %v1585_v23, 0.0  ;;  %v1647_v23 = vunpack.c.h.bf16 %v1825_v53 }
 0x56b   : > { %v1597_v39 = vadd.f32 1e-05, %v1587_v37  ;;  %v1826_v37 = vld [vmem:[%s1908_s26 + $0x18] sm:$0xff] }
 0x56c   : > { %v1628_v38 = vpop.permute.xlu1 %1627  ;;  %v1616_v46 = vpop.permute.xlu0 %1615 }
 0x56d   : > { %1818 = vrsqrt.f32 %v1597_v39  ;;  %v1648_v39 = vunpack.c.l.bf16 %v1826_v37 }
 0x57a   : > { %v1819_v12 = vpop.eup %1818 }
 0x57b   : > { %v1601_v43 = vmul.f32 %v1819_v12, %v1589_v25  ;;  %v1602_v59 = vmul.f32 %v1819_v12, %v1590_v30  ;;  %v1603_v10 = vmul.f32 %v1819_v12, %v1591_v33  ;;  %v1604_v27 = vmul.f32 %v1819_v12, %v1592_v17 }
 0x57d   : > { %v1618_v47 = vmul.f32 %v1611_v26, %v1601_v43  ;;  %v1619_v52 = vmul.f32 %v1611_v26, %v1602_v59  ;;  %v1620_v31 = vmul.f32 %v1611_v26, %v1603_v10  ;;  %v1621_v24 = vmul.f32 %v1611_v26, %v1604_v27 }
 0x57e   : > { %v1649_v26 = vunpack.c.h.bf16 %v1826_v37 }
 0x57f   : > { %v1634_v60 = vadd.f32 %v1628_v38, %v1618_v47  ;;  %v1635_v58 = vadd.f32 %v1628_v38, %v1619_v52  ;;  %v1636_v28 = vadd.f32 %v1628_v38, %v1620_v31  ;;  %v1637_v19 = vadd.f32 %v1628_v38, %v1621_v24 }
 0x581   : > { %v1650_v2 = vadd.f32 %v1642_v62, %v1634_v60  ;;  %v1651_v11 = vadd.f32 %v1643_v44, %v1635_v58  ;;  %v1652_v20 = vadd.f32 %v1644_v1, %v1636_v28  ;;  %v1653_v45 = vadd.f32 %v1645_v56, %v1637_v19 }
 0x583   : > { %vm1658_vm12 = vcmp.ge.f32.partialorder %v1650_v2, 0.0  ;;  %vm1659_vm13 = vcmp.ge.f32.partialorder %v1651_v11, 0.0  ;;  %vm1660_vm14 = vcmp.ge.f32.partialorder %v1652_v20, 0.0  ;;  %vm1661_vm15 = vcmp.ge.f32.partialorder %v1653_v45, 0.0 }
 0x584   : > { %v1666_v48 = vmul.f32 0.01, %v1650_v2  ;;  %v1667_v9 = vmul.f32 0.01, %v1651_v11  ;;  %v1668_v63 = vmul.f32 0.01, %v1652_v20 }
 0x585   : > { %v1669_v13 = vmul.f32 0.01, %v1653_v45 }
 0x586   : > { %v1674_v21 = vsel %vm1658_vm12, %v1650_v2, %v1666_v48  ;;  %v1675_v42 = vsel %vm1659_vm13, %v1651_v11, %v1667_v9  ;;  %v1676_v29 = vsel %vm1660_vm14, %v1652_v20, %v1668_v63 }
 0x587   : > { %v1677_v3 = vsel %vm1661_vm15, %v1653_v45, %v1669_v13  ;;  %1682 = vst [vmem:[%s2829_s8] sm:$0xff] %v1674_v21  ;;  %1683 = vst [vmem:[%s2829_s8 + $0x8] sm:$0xff] %v1675_v42 }
 0x588   : > { %1684 = vst [vmem:[%s2829_s8 + $0x10] sm:$0xff] %v1676_v29  ;;  %1685 = vst [vmem:[%s2829_s8 + $0x18] sm:$0xff] %v1677_v3 }
 0x59e   : > { %v1580_v15 = vpop.xlane.xlu1 %1579 }
 0x59f   : > { %v1582_v0 = vmul.f32 0.001953125, %v1580_v15 }
 0x5a1   : > { %v1586_v50 = vsub.f32 %v1582_v0, %v1584_v34 }
 0x5a2   : > { %v1632_v33 = vpop.permute.xlu1 %1631 }
 0x5a3   : > { %v1588_v40 = vmax.f32 %v1586_v50, 0.0 }
 0x5a5   : > { %v1598_v14 = vadd.f32 1e-05, %v1588_v40 }
 0x5a7   : > { %1820 = vrsqrt.f32 %v1598_v14 }
 0x5b4   : > { %v1821_v36 = vpop.eup %1820 }
 0x5b5   : > { %v1605_v7 = vmul.f32 %v1821_v36, %v1593_v8  ;;  %v1606_v32 = vmul.f32 %v1821_v36, %v1594_v6  ;;  %v1607_v51 = vmul.f32 %v1821_v36, %v1595_v5  ;;  %v1608_v4 = vmul.f32 %v1821_v36, %v1596_v57 }
 0x5b7   : > { %v1622_v25 = vmul.f32 %v1616_v46, %v1605_v7  ;;  %v1623_v16 = vmul.f32 %v1616_v46, %v1606_v32  ;;  %v1624_v30 = vmul.f32 %v1616_v46, %v1607_v51  ;;  %v1625_v41 = vmul.f32 %v1616_v46, %v1608_v4 }
 0x5b9   : > { %v1638_v18 = vadd.f32 %v1632_v33, %v1622_v25  ;;  %v1639_v17 = vadd.f32 %v1632_v33, %v1623_v16  ;;  %v1640_v55 = vadd.f32 %v1632_v33, %v1624_v30  ;;  %v1641_v12 = vadd.f32 %v1632_v33, %v1625_v41 }
 0x5bb   : > { %v1654_v43 = vadd.f32 %v1646_v35, %v1638_v18  ;;  %v1655_v59 = vadd.f32 %v1647_v23, %v1639_v17  ;;  %v1656_v10 = vadd.f32 %v1648_v39, %v1640_v55  ;;  %v1657_v27 = vadd.f32 %v1649_v26, %v1641_v12 }
 0x5bd   : > { %vm1662_vm0 = vcmp.ge.f32.partialorder %v1654_v43, 0.0  ;;  %vm1663_vm1 = vcmp.ge.f32.partialorder %v1655_v59, 0.0  ;;  %vm1664_vm2 = vcmp.ge.f32.partialorder %v1656_v10, 0.0  ;;  %vm1665_vm3 = vcmp.ge.f32.partialorder %v1657_v27, 0.0 }
 0x5be   : > { %v1670_v61 = vmul.f32 0.01, %v1654_v43  ;;  %v1671_v62 = vmul.f32 0.01, %v1655_v59  ;;  %v1672_v44 = vmul.f32 0.01, %v1656_v10 }
 0x5bf   : > { %v1673_v54 = vmul.f32 0.01, %v1657_v27 }
 0x5c0   : > { %v1678_v1 = vsel %vm1662_vm0, %v1654_v43, %v1670_v61  ;;  %v1679_v56 = vsel %vm1663_vm1, %v1655_v59, %v1671_v62  ;;  %v1680_v47 = vsel %vm1664_vm2, %v1656_v10, %v1672_v44 }
 0x5c1   : > { %v1681_v52 = vsel %vm1665_vm3, %v1657_v27, %v1673_v54  ;;  %1686 = vst [vmem:[%s2829_s8 + $0x20] sm:$0xff] %v1678_v1  ;;  %1687 = vst [vmem:[%s2829_s8 + $0x28] sm:$0xff] %v1679_v56 }
 0x5c2   : > { %1688 = vst [vmem:[%s2829_s8 + $0x30] sm:$0xff] %v1680_v47  ;;  %1689 = vst [vmem:[%s2829_s8 + $0x38] sm:$0xff] %v1681_v52 }
 0x5c3 PF: > { %s16_s21 = sadd.s32 1, %s1833_s21  }
 0x5c4   : > { %p13_p4 = scmp.ge.s32.totalorder %s16_s21, 4  }
 0x5c6   :  { %15 = sbr.rel (!%p13_p4) target bundleno = 1 (0x1), region = 74 }

</bundles_post_ra>
